<compile_context>
chip_gen: v7x
topology: tpu7x:2x2x1
jax: 0.10.0
libtpu: 0.0.40
codegen_flags: <defaults>
</compile_context>

<pallas_src>
import jax
import jax.numpy as jnp
from jax import lax
from jax.experimental import pallas as pl
from jax.experimental.pallas import tpu as pltpu


def _round_up(x, m):
    return ((x + m - 1) // m) * m


def find_lengths(messages):
    """Position of first 0 symbol + 1, clamped to max length (EGG find_lengths)."""
    max_k = messages.shape[1]
    zero_mask = messages == 0
    lengths = max_k - jnp.sum(jnp.cumsum(zero_mask, axis=1) > 0, axis=1)
    lengths = jnp.minimum(lengths + 1, max_k)
    return lengths.astype(jnp.int32)


def _rnn_receiver_kernel(msg_ref, len_ref, w_in_ref, w_hh_ref, w_fc_ref,
                         b_fc_ref, out_ref):
    """One batch tile: hoisted input projection, serial RNN recurrence, fused fc."""
    Bt, T = msg_ref.shape
    Vp, Hp = w_in_ref.shape

    msg = msg_ref[...]                  # (Bt, T)  int32 symbols
    lengths = len_ref[...]              # (Bt, 1)  int32
    w_in = w_in_ref[...]                # (Vp, Hp) = [embedding @ W_ih ; bias row]
    w_hh = w_hh_ref[...]                # (Hp, Hp)

    lane_iota = lax.broadcasted_iota(jnp.int32, (Bt, Vp), 1)
    bias_lane = Vp - 1                  # always-hot lane -> adds b_ih+b_hh via the MXU

    # Hoisted input projection: T independent matmuls, off the serial chain.
    # (message symbols are < V <= Vp-1, so they never collide with the bias lane)
    xs = []
    for t in range(T):
        sym = msg[:, t:t + 1]                                       # (Bt, 1)
        oh = ((lane_iota == sym) | (lane_iota == bias_lane)).astype(jnp.float32)
        xs.append(jnp.dot(oh, w_in, preferred_element_type=jnp.float32))  # (Bt, Hp)

    # Serial recurrence: one MXU matmul + tanh per step.
    # T is a small static constant -> fully unrolled with static indices.
    # TODO(synk): switch to lax.fori_loop with a (T, Bt) message layout if T grows >~16.
    h = jnp.zeros((Bt, Hp), jnp.float32)
    for t in range(T):
        h_new = jnp.tanh(xs[t] + jnp.dot(h, w_hh,
                                         preferred_element_type=jnp.float32))
        # Freeze the state after the EOS step: final h == hidden at index lengths-1.
        h = jnp.where(t < lengths, h_new, h)

    out_ref[...] = (jnp.dot(h, w_fc_ref[...], preferred_element_type=jnp.float32)
                    + b_fc_ref[...])


def rnn_receiver_deterministic(message, params, *, batch_tile=1024):
    """Forward pass of RnnReceiverDeterministic. Returns (agent_output, logits, entropy)."""
    B, T = message.shape
    V, E = params["embedding"].shape
    H = params["w_hh"].shape[0]
    O = params["w_fc"].shape[1]

    # Fold the embedding lookup into the input projection: one_hot @ (emb @ W_ih).
    w_in = jnp.dot(params["embedding"], params["w_ih"],
                   precision=lax.Precision.HIGHEST)                   # (V, H)
    b = (params["b_ih"] + params["b_hh"]).reshape(H)

    # Zero-pad feature dims to lane width; reserve the last vocab lane for the bias.
    Vp = _round_up(V + 1, 128)
    Hp = _round_up(H, 128)
    Op = _round_up(O, 128)
    w_in_p = jnp.zeros((Vp, Hp), jnp.float32).at[:V, :H].set(w_in)
    w_in_p = w_in_p.at[Vp - 1, :H].set(b)          # bias row (always-hot lane), cols :H only
    w_hh_p = jnp.zeros((Hp, Hp), jnp.float32).at[:H, :H].set(params["w_hh"])
    w_fc_p = jnp.zeros((Hp, Op), jnp.float32).at[:H, :O].set(params["w_fc"])
    b_fc_p = jnp.zeros((1, Op), jnp.float32).at[:, :O].set(
        params["b_fc"].reshape(1, O))

    # Batch tiling. Pad B to a sublane multiple; prefer >= 2 grid steps so both
    # TensorCores are used on v7x. Padded rows are all-zero messages, sliced off later.
    B8 = _round_up(B, 8)
    Bt = min(batch_tile, B8)
    if B8 >= 16 and Bt >= B8:
        Bt = _round_up(B8 // 2, 8)
    B_pad = _round_up(B8, Bt)

    msg_p = jnp.zeros((B_pad, T), jnp.int32).at[:B].set(message.astype(jnp.int32))
    lengths = find_lengths(msg_p).reshape(B_pad, 1)

    grid = (B_pad // Bt,)

    out_pad = pl.pallas_call(
        _rnn_receiver_kernel,
        out_shape=jax.ShapeDtypeStruct((B_pad, Op), jnp.float32),
        grid=grid,
        in_specs=[
            pl.BlockSpec((Bt, T), lambda i: (i, 0)),      # int32 message tile
            pl.BlockSpec((Bt, 1), lambda i: (i, 0)),      # lengths tile
            pl.BlockSpec((Vp, Hp), lambda i: (0, 0)),     # W_in (+ bias row, resident)
            pl.BlockSpec((Hp, Hp), lambda i: (0, 0)),     # W_hh (resident)
            pl.BlockSpec((Hp, Op), lambda i: (0, 0)),     # agent W_fc (resident)
            pl.BlockSpec((1, Op), lambda i: (0, 0)),      # agent b_fc
        ],
        out_specs=pl.BlockSpec((Bt, Op), lambda i: (i, 0)),
        compiler_params=pltpu.CompilerParams(
            dimension_semantics=("parallel",),
            vmem_limit_bytes=64 * 1024 * 1024),
    )(msg_p, lengths, w_in_p, w_hh_p, w_fc_p, b_fc_p)

    agent_output = out_pad[:B, :O]
    logits = jnp.zeros((B,), jnp.float32)   # zero log-probs / entropy, as in the module
    entropy = logits
    return agent_output, logits, entropy


def _reference(message, params):
    """Pure-JAX reference of the same forward pass (for a correctness check)."""
    B, T = message.shape
    H = params["w_hh"].shape[0]
    lengths = find_lengths(message)
    emb = params["embedding"][message]                     # (B, T, E)
    h = jnp.zeros((B, H), jnp.float32)
    for t in range(T):
        h_new = jnp.tanh(emb[:, t] @ params["w_ih"] + params["b_ih"]
                         + h @ params["w_hh"] + params["b_hh"])
        h = jnp.where((t < lengths)[:, None], h_new, h)
    return h @ params["w_fc"] + params["b_fc"]


if __name__ == "__main__":
    # Small shapes consistent with the module (batch of variable-length symbol messages).
    B, T = 16, 8                 # batch, message length
    V, E, H, O = 10, 16, 32, 8   # vocab, embed_dim, hidden_size, agent output dim

    key = jax.random.PRNGKey(0)
    ks = jax.random.split(key, 8)
    params = {
        "embedding": jax.random.normal(ks[0], (V, E), jnp.float32) * 0.1,
        "w_ih": jax.random.normal(ks[1], (E, H), jnp.float32) * 0.1,
        "w_hh": jax.random.normal(ks[2], (H, H), jnp.float32) * 0.1,
        "b_ih": jax.random.normal(ks[3], (1, H), jnp.float32) * 0.1,
        "b_hh": jax.random.normal(ks[4], (1, H), jnp.float32) * 0.1,
        "w_fc": jax.random.normal(ks[5], (H, O), jnp.float32) * 0.1,
        "b_fc": jax.random.normal(ks[6], (1, O), jnp.float32) * 0.1,
    }
    message = jax.random.randint(ks[7], (B, T), 0, V, dtype=jnp.int32)

    out, logits, entropy = rnn_receiver_deterministic(message, params)
    jax.block_until_ready((out, logits, entropy))

    assert out.shape == (B, O)
    assert logits.shape == (B,) and entropy.shape == (B,)
    assert bool(jnp.all(logits == 0)) and bool(jnp.all(entropy == 0))

    ref = _reference(message, params)
    max_err = float(jnp.max(jnp.abs(out - ref)))
    assert max_err < 5e-3, f"mismatch vs reference: {max_err}"
    print("KERNEL_OK")
</pallas_src>

<mosaic_0001>
module attributes {stable_mosaic.version = 11 : i64} {
  func.func @_rnn_receiver_kernel(%arg0: i32, %arg1: memref<8x8xi32, #tpu.memory_space<vmem>>, %arg2: memref<8x1xi32, #tpu.memory_space<vmem>>, %arg3: memref<128x128xf32, #tpu.memory_space<vmem>>, %arg4: memref<128x128xf32, #tpu.memory_space<vmem>>, %arg5: memref<128x128xf32, #tpu.memory_space<vmem>>, %arg6: memref<1x128xf32, #tpu.memory_space<vmem>>, %arg7: memref<8x128xf32, #tpu.memory_space<vmem>>) attributes {dimension_semantics = [#tpu.dimension_semantics<parallel>], iteration_bounds = array<i64: 2>, scalar_prefetch = 0 : i64, scratch_operands = 0 : i64, tpu.core_type = #tpu.core_type<tc>, window_params = [{transform_indices = @transform_0, window_bounds = array<i64: 8, 8>}, {transform_indices = @transform_1, window_bounds = array<i64: 8, 1>}, {pipeline_mode = #tpu.pipeline_mode<synchronous>, transform_indices = @transform_2, window_bounds = array<i64: 128, 128>}, {pipeline_mode = #tpu.pipeline_mode<synchronous>, transform_indices = @transform_3, window_bounds = array<i64: 128, 128>}, {pipeline_mode = #tpu.pipeline_mode<synchronous>, transform_indices = @transform_4, window_bounds = array<i64: 128, 128>}, {pipeline_mode = #tpu.pipeline_mode<synchronous>, transform_indices = @transform_5, window_bounds = array<i64: 1, 128>}, {transform_indices = @transform_6, window_bounds = array<i64: 8, 128>}]} {
    %c0 = arith.constant 0 : index
    %c0_0 = arith.constant 0 : index
    %0 = vector.load %arg1[%c0, %c0_0] : memref<8x8xi32, #tpu.memory_space<vmem>>, vector<8x8xi32>
    %c0_1 = arith.constant 0 : index
    %c0_2 = arith.constant 0 : index
    %1 = vector.load %arg2[%c0_1, %c0_2] : memref<8x1xi32, #tpu.memory_space<vmem>>, vector<8x1xi32>
    %c0_3 = arith.constant 0 : index
    %c0_4 = arith.constant 0 : index
    %2 = vector.load %arg3[%c0_3, %c0_4] : memref<128x128xf32, #tpu.memory_space<vmem>>, vector<128x128xf32>
    %c0_5 = arith.constant 0 : index
    %c0_6 = arith.constant 0 : index
    %3 = vector.load %arg4[%c0_5, %c0_6] : memref<128x128xf32, #tpu.memory_space<vmem>>, vector<128x128xf32>
    %4 = tpu.iota {dimensions = array<i32: 1>} : vector<8x128xi32>
    %5 = vector.extract_strided_slice %0 {offsets = [0, 0], sizes = [8, 1], strides = [1, 1]} : vector<8x8xi32> to vector<8x1xi32>
    %6 = vector.broadcast %5 : vector<8x1xi32> to vector<8x128xi32>
    %7 = arith.cmpi eq, %4, %6 : vector<8x128xi32>
    %c127_i32 = arith.constant 127 : i32
    %8 = vector.broadcast %c127_i32 : i32 to vector<8x128xi32>
    %9 = arith.cmpi eq, %4, %8 : vector<8x128xi32>
    %10 = arith.ori %7, %9 : vector<8x128xi1>
    %11 = arith.extui %10 : vector<8x128xi1> to vector<8x128xi32>
    %12 = arith.sitofp %11 : vector<8x128xi32> to vector<8x128xf32>
    %cst = arith.constant dense<0.000000e+00> : vector<8x128xf32>
    %13 = tpu.matmul %12, %2, %cst {dimension_numbers = #tpu.dot_dimension_numbers<[1], [0], [0], [1], [0, 0, 1, 1], [], []>} : vector<8x128xf32>, vector<128x128xf32>, vector<8x128xf32> -> vector<8x128xf32>
    %14 = vector.extract_strided_slice %0 {offsets = [0, 1], sizes = [8, 1], strides = [1, 1]} : vector<8x8xi32> to vector<8x1xi32>
    %15 = vector.broadcast %14 : vector<8x1xi32> to vector<8x128xi32>
    %16 = arith.cmpi eq, %4, %15 : vector<8x128xi32>
    %c127_i32_7 = arith.constant 127 : i32
    %17 = vector.broadcast %c127_i32_7 : i32 to vector<8x128xi32>
    %18 = arith.cmpi eq, %4, %17 : vector<8x128xi32>
    %19 = arith.ori %16, %18 : vector<8x128xi1>
    %20 = arith.extui %19 : vector<8x128xi1> to vector<8x128xi32>
    %21 = arith.sitofp %20 : vector<8x128xi32> to vector<8x128xf32>
    %cst_8 = arith.constant dense<0.000000e+00> : vector<8x128xf32>
    %22 = tpu.matmul %21, %2, %cst_8 {dimension_numbers = #tpu.dot_dimension_numbers<[1], [0], [0], [1], [0, 0, 1, 1], [], []>} : vector<8x128xf32>, vector<128x128xf32>, vector<8x128xf32> -> vector<8x128xf32>
    %23 = vector.extract_strided_slice %0 {offsets = [0, 2], sizes = [8, 1], strides = [1, 1]} : vector<8x8xi32> to vector<8x1xi32>
    %24 = vector.broadcast %23 : vector<8x1xi32> to vector<8x128xi32>
    %25 = arith.cmpi eq, %4, %24 : vector<8x128xi32>
    %c127_i32_9 = arith.constant 127 : i32
    %26 = vector.broadcast %c127_i32_9 : i32 to vector<8x128xi32>
    %27 = arith.cmpi eq, %4, %26 : vector<8x128xi32>
    %28 = arith.ori %25, %27 : vector<8x128xi1>
    %29 = arith.extui %28 : vector<8x128xi1> to vector<8x128xi32>
    %30 = arith.sitofp %29 : vector<8x128xi32> to vector<8x128xf32>
    %cst_10 = arith.constant dense<0.000000e+00> : vector<8x128xf32>
    %31 = tpu.matmul %30, %2, %cst_10 {dimension_numbers = #tpu.dot_dimension_numbers<[1], [0], [0], [1], [0, 0, 1, 1], [], []>} : vector<8x128xf32>, vector<128x128xf32>, vector<8x128xf32> -> vector<8x128xf32>
    %32 = vector.extract_strided_slice %0 {offsets = [0, 3], sizes = [8, 1], strides = [1, 1]} : vector<8x8xi32> to vector<8x1xi32>
    %33 = vector.broadcast %32 : vector<8x1xi32> to vector<8x128xi32>
    %34 = arith.cmpi eq, %4, %33 : vector<8x128xi32>
    %c127_i32_11 = arith.constant 127 : i32
    %35 = vector.broadcast %c127_i32_11 : i32 to vector<8x128xi32>
    %36 = arith.cmpi eq, %4, %35 : vector<8x128xi32>
    %37 = arith.ori %34, %36 : vector<8x128xi1>
    %38 = arith.extui %37 : vector<8x128xi1> to vector<8x128xi32>
    %39 = arith.sitofp %38 : vector<8x128xi32> to vector<8x128xf32>
    %cst_12 = arith.constant dense<0.000000e+00> : vector<8x128xf32>
    %40 = tpu.matmul %39, %2, %cst_12 {dimension_numbers = #tpu.dot_dimension_numbers<[1], [0], [0], [1], [0, 0, 1, 1], [], []>} : vector<8x128xf32>, vector<128x128xf32>, vector<8x128xf32> -> vector<8x128xf32>
    %41 = vector.extract_strided_slice %0 {offsets = [0, 4], sizes = [8, 1], strides = [1, 1]} : vector<8x8xi32> to vector<8x1xi32>
    %42 = vector.broadcast %41 : vector<8x1xi32> to vector<8x128xi32>
    %43 = arith.cmpi eq, %4, %42 : vector<8x128xi32>
    %c127_i32_13 = arith.constant 127 : i32
    %44 = vector.broadcast %c127_i32_13 : i32 to vector<8x128xi32>
    %45 = arith.cmpi eq, %4, %44 : vector<8x128xi32>
    %46 = arith.ori %43, %45 : vector<8x128xi1>
    %47 = arith.extui %46 : vector<8x128xi1> to vector<8x128xi32>
    %48 = arith.sitofp %47 : vector<8x128xi32> to vector<8x128xf32>
    %cst_14 = arith.constant dense<0.000000e+00> : vector<8x128xf32>
    %49 = tpu.matmul %48, %2, %cst_14 {dimension_numbers = #tpu.dot_dimension_numbers<[1], [0], [0], [1], [0, 0, 1, 1], [], []>} : vector<8x128xf32>, vector<128x128xf32>, vector<8x128xf32> -> vector<8x128xf32>
    %50 = vector.extract_strided_slice %0 {offsets = [0, 5], sizes = [8, 1], strides = [1, 1]} : vector<8x8xi32> to vector<8x1xi32>
    %51 = vector.broadcast %50 : vector<8x1xi32> to vector<8x128xi32>
    %52 = arith.cmpi eq, %4, %51 : vector<8x128xi32>
    %c127_i32_15 = arith.constant 127 : i32
    %53 = vector.broadcast %c127_i32_15 : i32 to vector<8x128xi32>
    %54 = arith.cmpi eq, %4, %53 : vector<8x128xi32>
    %55 = arith.ori %52, %54 : vector<8x128xi1>
    %56 = arith.extui %55 : vector<8x128xi1> to vector<8x128xi32>
    %57 = arith.sitofp %56 : vector<8x128xi32> to vector<8x128xf32>
    %cst_16 = arith.constant dense<0.000000e+00> : vector<8x128xf32>
    %58 = tpu.matmul %57, %2, %cst_16 {dimension_numbers = #tpu.dot_dimension_numbers<[1], [0], [0], [1], [0, 0, 1, 1], [], []>} : vector<8x128xf32>, vector<128x128xf32>, vector<8x128xf32> -> vector<8x128xf32>
    %59 = vector.extract_strided_slice %0 {offsets = [0, 6], sizes = [8, 1], strides = [1, 1]} : vector<8x8xi32> to vector<8x1xi32>
    %60 = vector.broadcast %59 : vector<8x1xi32> to vector<8x128xi32>
    %61 = arith.cmpi eq, %4, %60 : vector<8x128xi32>
    %c127_i32_17 = arith.constant 127 : i32
    %62 = vector.broadcast %c127_i32_17 : i32 to vector<8x128xi32>
    %63 = arith.cmpi eq, %4, %62 : vector<8x128xi32>
    %64 = arith.ori %61, %63 : vector<8x128xi1>
    %65 = arith.extui %64 : vector<8x128xi1> to vector<8x128xi32>
    %66 = arith.sitofp %65 : vector<8x128xi32> to vector<8x128xf32>
    %cst_18 = arith.constant dense<0.000000e+00> : vector<8x128xf32>
    %67 = tpu.matmul %66, %2, %cst_18 {dimension_numbers = #tpu.dot_dimension_numbers<[1], [0], [0], [1], [0, 0, 1, 1], [], []>} : vector<8x128xf32>, vector<128x128xf32>, vector<8x128xf32> -> vector<8x128xf32>
    %68 = vector.extract_strided_slice %0 {offsets = [0, 7], sizes = [8, 1], strides = [1, 1]} : vector<8x8xi32> to vector<8x1xi32>
    %69 = vector.broadcast %68 : vector<8x1xi32> to vector<8x128xi32>
    %70 = arith.cmpi eq, %4, %69 : vector<8x128xi32>
    %c127_i32_19 = arith.constant 127 : i32
    %71 = vector.broadcast %c127_i32_19 : i32 to vector<8x128xi32>
    %72 = arith.cmpi eq, %4, %71 : vector<8x128xi32>
    %73 = arith.ori %70, %72 : vector<8x128xi1>
    %74 = arith.extui %73 : vector<8x128xi1> to vector<8x128xi32>
    %75 = arith.sitofp %74 : vector<8x128xi32> to vector<8x128xf32>
    %cst_20 = arith.constant dense<0.000000e+00> : vector<8x128xf32>
    %76 = tpu.matmul %75, %2, %cst_20 {dimension_numbers = #tpu.dot_dimension_numbers<[1], [0], [0], [1], [0, 0, 1, 1], [], []>} : vector<8x128xf32>, vector<128x128xf32>, vector<8x128xf32> -> vector<8x128xf32>
    %cst_21 = arith.constant 0.000000e+00 : f32
    %77 = vector.broadcast %cst_21 : f32 to vector<8x128xf32>
    %cst_22 = arith.constant dense<0.000000e+00> : vector<8x128xf32>
    %78 = tpu.matmul %77, %3, %cst_22 {dimension_numbers = #tpu.dot_dimension_numbers<[1], [0], [0], [1], [0, 0, 1, 1], [], []>} : vector<8x128xf32>, vector<128x128xf32>, vector<8x128xf32> -> vector<8x128xf32>
    %79 = arith.addf %13, %78 : vector<8x128xf32>
    %80 = math.tanh %79 : vector<8x128xf32>
    %c0_i32 = arith.constant 0 : i32
    %81 = vector.broadcast %c0_i32 : i32 to vector<8x1xi32>
    %82 = arith.cmpi sgt, %1, %81 : vector<8x1xi32>
    %83 = vector.shape_cast %82 : vector<8x1xi1> to vector<8x1xi1>
    %84 = vector.broadcast %83 : vector<8x1xi1> to vector<8x128xi1>
    %85 = arith.select %84, %80, %77 : vector<8x128xi1>, vector<8x128xf32>
    %cst_23 = arith.constant dense<0.000000e+00> : vector<8x128xf32>
    %86 = tpu.matmul %85, %3, %cst_23 {dimension_numbers = #tpu.dot_dimension_numbers<[1], [0], [0], [1], [0, 0, 1, 1], [], []>} : vector<8x128xf32>, vector<128x128xf32>, vector<8x128xf32> -> vector<8x128xf32>
    %87 = arith.addf %22, %86 : vector<8x128xf32>
    %88 = math.tanh %87 : vector<8x128xf32>
    %c1_i32 = arith.constant 1 : i32
    %89 = vector.broadcast %c1_i32 : i32 to vector<8x1xi32>
    %90 = arith.cmpi sgt, %1, %89 : vector<8x1xi32>
    %91 = vector.shape_cast %90 : vector<8x1xi1> to vector<8x1xi1>
    %92 = vector.broadcast %91 : vector<8x1xi1> to vector<8x128xi1>
    %93 = arith.select %92, %88, %85 : vector<8x128xi1>, vector<8x128xf32>
    %cst_24 = arith.constant dense<0.000000e+00> : vector<8x128xf32>
    %94 = tpu.matmul %93, %3, %cst_24 {dimension_numbers = #tpu.dot_dimension_numbers<[1], [0], [0], [1], [0, 0, 1, 1], [], []>} : vector<8x128xf32>, vector<128x128xf32>, vector<8x128xf32> -> vector<8x128xf32>
    %95 = arith.addf %31, %94 : vector<8x128xf32>
    %96 = math.tanh %95 : vector<8x128xf32>
    %c2_i32 = arith.constant 2 : i32
    %97 = vector.broadcast %c2_i32 : i32 to vector<8x1xi32>
    %98 = arith.cmpi sgt, %1, %97 : vector<8x1xi32>
    %99 = vector.shape_cast %98 : vector<8x1xi1> to vector<8x1xi1>
    %100 = vector.broadcast %99 : vector<8x1xi1> to vector<8x128xi1>
    %101 = arith.select %100, %96, %93 : vector<8x128xi1>, vector<8x128xf32>
    %cst_25 = arith.constant dense<0.000000e+00> : vector<8x128xf32>
    %102 = tpu.matmul %101, %3, %cst_25 {dimension_numbers = #tpu.dot_dimension_numbers<[1], [0], [0], [1], [0, 0, 1, 1], [], []>} : vector<8x128xf32>, vector<128x128xf32>, vector<8x128xf32> -> vector<8x128xf32>
    %103 = arith.addf %40, %102 : vector<8x128xf32>
    %104 = math.tanh %103 : vector<8x128xf32>
    %c3_i32 = arith.constant 3 : i32
    %105 = vector.broadcast %c3_i32 : i32 to vector<8x1xi32>
    %106 = arith.cmpi sgt, %1, %105 : vector<8x1xi32>
    %107 = vector.shape_cast %106 : vector<8x1xi1> to vector<8x1xi1>
    %108 = vector.broadcast %107 : vector<8x1xi1> to vector<8x128xi1>
    %109 = arith.select %108, %104, %101 : vector<8x128xi1>, vector<8x128xf32>
    %cst_26 = arith.constant dense<0.000000e+00> : vector<8x128xf32>
    %110 = tpu.matmul %109, %3, %cst_26 {dimension_numbers = #tpu.dot_dimension_numbers<[1], [0], [0], [1], [0, 0, 1, 1], [], []>} : vector<8x128xf32>, vector<128x128xf32>, vector<8x128xf32> -> vector<8x128xf32>
    %111 = arith.addf %49, %110 : vector<8x128xf32>
    %112 = math.tanh %111 : vector<8x128xf32>
    %c4_i32 = arith.constant 4 : i32
    %113 = vector.broadcast %c4_i32 : i32 to vector<8x1xi32>
    %114 = arith.cmpi sgt, %1, %113 : vector<8x1xi32>
    %115 = vector.shape_cast %114 : vector<8x1xi1> to vector<8x1xi1>
    %116 = vector.broadcast %115 : vector<8x1xi1> to vector<8x128xi1>
    %117 = arith.select %116, %112, %109 : vector<8x128xi1>, vector<8x128xf32>
    %cst_27 = arith.constant dense<0.000000e+00> : vector<8x128xf32>
    %118 = tpu.matmul %117, %3, %cst_27 {dimension_numbers = #tpu.dot_dimension_numbers<[1], [0], [0], [1], [0, 0, 1, 1], [], []>} : vector<8x128xf32>, vector<128x128xf32>, vector<8x128xf32> -> vector<8x128xf32>
    %119 = arith.addf %58, %118 : vector<8x128xf32>
    %120 = math.tanh %119 : vector<8x128xf32>
    %c5_i32 = arith.constant 5 : i32
    %121 = vector.broadcast %c5_i32 : i32 to vector<8x1xi32>
    %122 = arith.cmpi sgt, %1, %121 : vector<8x1xi32>
    %123 = vector.shape_cast %122 : vector<8x1xi1> to vector<8x1xi1>
    %124 = vector.broadcast %123 : vector<8x1xi1> to vector<8x128xi1>
    %125 = arith.select %124, %120, %117 : vector<8x128xi1>, vector<8x128xf32>
    %cst_28 = arith.constant dense<0.000000e+00> : vector<8x128xf32>
    %126 = tpu.matmul %125, %3, %cst_28 {dimension_numbers = #tpu.dot_dimension_numbers<[1], [0], [0], [1], [0, 0, 1, 1], [], []>} : vector<8x128xf32>, vector<128x128xf32>, vector<8x128xf32> -> vector<8x128xf32>
    %127 = arith.addf %67, %126 : vector<8x128xf32>
    %128 = math.tanh %127 : vector<8x128xf32>
    %c6_i32 = arith.constant 6 : i32
    %129 = vector.broadcast %c6_i32 : i32 to vector<8x1xi32>
    %130 = arith.cmpi sgt, %1, %129 : vector<8x1xi32>
    %131 = vector.shape_cast %130 : vector<8x1xi1> to vector<8x1xi1>
    %132 = vector.broadcast %131 : vector<8x1xi1> to vector<8x128xi1>
    %133 = arith.select %132, %128, %125 : vector<8x128xi1>, vector<8x128xf32>
    %cst_29 = arith.constant dense<0.000000e+00> : vector<8x128xf32>
    %134 = tpu.matmul %133, %3, %cst_29 {dimension_numbers = #tpu.dot_dimension_numbers<[1], [0], [0], [1], [0, 0, 1, 1], [], []>} : vector<8x128xf32>, vector<128x128xf32>, vector<8x128xf32> -> vector<8x128xf32>
    %135 = arith.addf %76, %134 : vector<8x128xf32>
    %136 = math.tanh %135 : vector<8x128xf32>
    %c7_i32 = arith.constant 7 : i32
    %137 = vector.broadcast %c7_i32 : i32 to vector<8x1xi32>
    %138 = arith.cmpi sgt, %1, %137 : vector<8x1xi32>
    %139 = vector.shape_cast %138 : vector<8x1xi1> to vector<8x1xi1>
    %140 = vector.broadcast %139 : vector<8x1xi1> to vector<8x128xi1>
    %141 = arith.select %140, %136, %133 : vector<8x128xi1>, vector<8x128xf32>
    %c0_30 = arith.constant 0 : index
    %c0_31 = arith.constant 0 : index
    %142 = vector.load %arg5[%c0_30, %c0_31] : memref<128x128xf32, #tpu.memory_space<vmem>>, vector<128x128xf32>
    %cst_32 = arith.constant dense<0.000000e+00> : vector<8x128xf32>
    %143 = tpu.matmul %141, %142, %cst_32 {dimension_numbers = #tpu.dot_dimension_numbers<[1], [0], [0], [1], [0, 0, 1, 1], [], []>} : vector<8x128xf32>, vector<128x128xf32>, vector<8x128xf32> -> vector<8x128xf32>
    %c0_33 = arith.constant 0 : index
    %c0_34 = arith.constant 0 : index
    %144 = vector.load %arg6[%c0_33, %c0_34] : memref<1x128xf32, #tpu.memory_space<vmem>>, vector<1x128xf32>
    %145 = vector.broadcast %144 : vector<1x128xf32> to vector<8x128xf32>
    %146 = arith.addf %143, %145 : vector<8x128xf32>
    %c0_35 = arith.constant 0 : index
    %c0_36 = arith.constant 0 : index
    %147 = vector.load %arg7[%c0_35, %c0_36] : memref<8x128xf32, #tpu.memory_space<vmem>>, vector<8x128xf32>
    tpu.vector_store %arg7[%c0_35, %c0_36], %146 {strides = array<i32>} : memref<8x128xf32, #tpu.memory_space<vmem>>, vector<8x128xf32>,
    return
  }
  func.func @transform_0(%arg0: i32) -> (i32, i32) {
    %c0_i32 = arith.constant 0 : i32
    %c0_i32_0 = arith.constant 0 : i32
    return %arg0, %c0_i32 : i32, i32
  }
  func.func @transform_1(%arg0: i32) -> (i32, i32) {
    %c0_i32 = arith.constant 0 : i32
    %c0_i32_0 = arith.constant 0 : i32
    return %arg0, %c0_i32 : i32, i32
  }
  func.func @transform_2(%arg0: i32) -> (i32, i32) {
    %c0_i32 = arith.constant 0 : i32
    %c0_i32_0 = arith.constant 0 : i32
    %c0_i32_1 = arith.constant 0 : i32
    return %c0_i32, %c0_i32_0 : i32, i32
  }
  func.func @transform_3(%arg0: i32) -> (i32, i32) {
    %c0_i32 = arith.constant 0 : i32
    %c0_i32_0 = arith.constant 0 : i32
    %c0_i32_1 = arith.constant 0 : i32
    return %c0_i32, %c0_i32_0 : i32, i32
  }
  func.func @transform_4(%arg0: i32) -> (i32, i32) {
    %c0_i32 = arith.constant 0 : i32
    %c0_i32_0 = arith.constant 0 : i32
    %c0_i32_1 = arith.constant 0 : i32
    return %c0_i32, %c0_i32_0 : i32, i32
  }
  func.func @transform_5(%arg0: i32) -> (i32, i32) {
    %c0_i32 = arith.constant 0 : i32
    %c0_i32_0 = arith.constant 0 : i32
    %c0_i32_1 = arith.constant 0 : i32
    return %c0_i32, %c0_i32_0 : i32, i32
  }
  func.func @transform_6(%arg0: i32) -> (i32, i32) {
    %c0_i32 = arith.constant 0 : i32
    %c0_i32_0 = arith.constant 0 : i32
    return %arg0, %c0_i32 : i32, i32
  }
}

</mosaic_0001>

<bundles_post_ra>
// kernel: tpu_custom_call.1
= control target key start
LH: loop header
LB: loop body
LE: loop exit
PB: predicated region body
PF: predicated region fallthrough
CT: control target
= control target key end

     0   :  { %s4406_s0 = inlined_call_operand.hbm [shape: s32[16,8], index: 0, kind: input, shape index: {}]   ;;  %s4407_s1 = inlined_call_operand.hbm [shape: s32[16,1], index: 1, kind: input, shape index: {}]   ;;  %s4408_s2 = inlined_call_operand.hbm [shape: f32[128,128], index: 2, kind: input, shape index: {}]   ;;  %s4409_s3 = inlined_call_operand.hbm [shape: f32[128,128], index: 3, kind: input, shape index: {}]   ;;  %s4410_s4 = inlined_call_operand.hbm [shape: f32[128,128], index: 4, kind: input, shape index: {}]   ;;  %s4411_s5 = inlined_call_operand.hbm [shape: f32[1,128], index: 5, kind: input, shape index: {}]   ;;  %s4412_s6 = inlined_call_operand.hbm [shape: f32[16,128], index: 6, kind: output, shape index: {}]  }
   0x1   :  { %4417 = sst [smem:[#allocation20_spill]] %s4408_s2 }
   0x2   :  { %4418 = sst [smem:[#allocation21_spill]] %s4409_s3 }
   0x3   :  { %4419 = sst [smem:[#allocation22_spill]] %s4410_s4 }
   0x4   :  { %11 = vsyncpa [#allocation3], 0 }
   0x5   :  { %13 = vsyncpa [#allocation3 + $0x1], 0 }
   0x6   :  { %14 = vsyncpa [#allocation6], 0 }
   0x7   :  { %16 = vsyncpa [#allocation6 + $0x1], 0 }
   0x8   :  { %17 = vsyncpa [#allocation9], 0 }
   0x9   :  { %18 = vsyncpa [#allocation12], 0 }
   0xa   :  { %19 = vsyncpa [#allocation4], 0 }
   0xb   :  { %21 = vsyncpa [#allocation4 + $0x1], 0  ;;  %s3672_s21 = smov 0   ;;  %s3674_s22 = smov 0  }
   0xc   :  { %s3676_s23 = smov 0   ;;  %s3678_s24 = smov 0  }
   0xd LB: > { %s3616_s25 = smov [#allocation7]   ;;  %s3693_s27 = sadd.s32 4294967295, %s3614_s24   ;;  %s3614_s24 = sphi %s3678_s24, %s4446_s24   ;;  %s3610_s23 = sphi %s3676_s23, %s4445_s23   ;;  %s3606_s22 = sphi %s3674_s22, %s4444_s22   ;;  %s3602_s21 = sphi %s3672_s21, %s4443_s21  }
   0xe   : > { %s206_s26 = sshll.u32 %s3616_s25, 4  ;;  %p1877_p0 = scmp.ge.s32.totalorder %s3614_s24, 1  ;;  %s3698_s26 = int_to_ptr.vmem [resolvable:$true] %s206_s26 }
   0xf   : > { %p4413_p1 = scmp.eq.s32.totalorder %s3693_s27, 0  ;;  %p194_p2 = scmp.lt.s32.totalorder %s3614_s24, 3 }
  0x10   : > { %s3617_s29 = smov [#allocation8]   ;;  %s3618_s8 = smov [#allocation10]  }
  0x11   : > { %p3700_p3 = pnand %p1877_p0, %p194_p2  ;;  %s219_s30 = sshll.u32 %s3617_s29, 4  ;;  %s3713_s30 = int_to_ptr.vmem [resolvable:$true] %s219_s30 }
  0x12   : > { %s232_s9 = sshll.u32 %s3618_s8, 4  ;;  %s4422_s2 = sld [smem:[#allocation20_spill]]  ;;  %s3715_s9 = int_to_ptr.vmem [resolvable:$true] %s232_s9 }
  0x13   : > { %s4420_s28 = scalar_select %p3700_p3, 1, 0 }
  0x14   : > { %p3247_p5 = pneg %p3700_p3 }
  0x16   : > { %p3709_p6 = pnand %p3247_p5, %p4413_p1 }
  0x18   : > { %s3360_s12 = scalar_lea.hbm %s4422_s2, 2048  ;;  %p3725_p8 = pneg %p3709_p6 }
  0x19   : > { %p3361_p7 = scmp.ne.s32.totalorder %s4422_s2, %s3360_s12  ;;  %p3367_p11 = scmp.lt.u32.totalorder %s3360_s12, %s4422_s2 }
  0x1b   : > { %p3363_p9 = pnand %p3725_p8, %p3361_p7 }
  0x1d   : > { %p3364_p10 = pneg %p3363_p9 }
  0x1f   : > { %p3369_p12 = pnand %p3367_p11, %p3364_p10 }
  0x21   : > { %3372 = shalt.err (!%p3369_p12)
}
  0x22   : > { %s3373_s18 = scalar_lea.vmem %s3698_s26, 2048  ;;  %p3381_p5 = scmp.lt.s32.totalorder %s3698_s26, %s3698_s26 }
  0x23   : > { %p3374_p13 = scmp.ne.s32.totalorder %s3698_s26, %s3373_s18  ;;  %p3382_p4 = scmp.lt.s32.totalorder %s3373_s18, %s3373_s18 }
  0x25   : > { %p3376_p0 = pnand %p3374_p13, %p3725_p8  ;;  %p3383_p7 = por %p3382_p4, %p3381_p5 }
  0x27   : > { %p3377_p2 = pneg %p3376_p0 }
  0x29   : > { %p3384_p9 = pnand %p3383_p7, %p3377_p2 }
  0x2b   : > { %3387 = shalt.err (!%p3384_p9)
}
  0x2c   : > { %s3619_s19 = smov 128   ;;  %s3620_s20 = smov 8  }
  0x2d   : > { %3250 = dma.hbm_to_vmem [thread:$0]  (!%p3709_p6), %s4422_s2, 2048, %s3698_s26, [#allocation6], %s3619_s19, %s3619_s19, %s3620_s20  }
  0x2e   : > { %s4424_s3 = sld [smem:[#allocation21_spill]] }
  0x34   : > { %s3388_s11 = scalar_lea.hbm %s4424_s3, 2048 }
  0x35   : > { %p3389_p4 = scmp.ne.s32.totalorder %s4424_s3, %s3388_s11  ;;  %p3395_p12 = scmp.lt.u32.totalorder %s3388_s11, %s4424_s3 }
  0x37   : > { %p3391_p10 = pnand %p3389_p4, %p3725_p8 }
  0x39   : > { %p3392_p11 = pneg %p3391_p10 }
  0x3b   : > { %p3397_p13 = pnand %p3395_p12, %p3392_p11 }
  0x3d   : > { %3400 = shalt.err (!%p3397_p13)
}
  0x3e   : > { %s3401_s26 = scalar_lea.vmem %s3713_s30, 2048  ;;  %p3409_p7 = scmp.lt.s32.totalorder %s3713_s30, %s3713_s30 }
  0x3f   : > { %p3402_p0 = scmp.ne.s32.totalorder %s3713_s30, %s3401_s26  ;;  %p3410_p9 = scmp.lt.s32.totalorder %s3401_s26, %s3401_s26 }
  0x41   : > { %p3404_p2 = pnand %p3402_p0, %p3725_p8  ;;  %p3411_p4 = por %p3410_p9, %p3409_p7 }
  0x43   : > { %p3405_p5 = pneg %p3404_p2 }
  0x45   : > { %p3412_p10 = pnand %p3411_p4, %p3405_p5 }
  0x47   : > { %3415 = shalt.err (!%p3412_p10)
}
  0x48   : > { %3253 = dma.hbm_to_vmem [thread:$0]  (!%p3709_p6), %s4424_s3, 2048, %s3713_s30, [#allocation9], %s3619_s19, %s3619_s19, %s3620_s20  }
  0x49   : > { %s4425_s4 = sld [smem:[#allocation22_spill]] }
  0x4f   : > { %s3416_s8 = scalar_lea.hbm %s4425_s4, 2048 }
  0x50   : > { %p3417_p11 = scmp.ne.s32.totalorder %s4425_s4, %s3416_s8  ;;  %p3423_p0 = scmp.lt.u32.totalorder %s3416_s8, %s4425_s4 }
  0x52   : > { %p3419_p12 = pnand %p3417_p11, %p3725_p8 }
  0x54   : > { %p3420_p13 = pneg %p3419_p12 }
  0x56   : > { %p3425_p2 = pnand %p3423_p0, %p3420_p13 }
  0x58   : > { %3428 = shalt.err (!%p3425_p2)
}
  0x59   : > { %s3429_s30 = scalar_lea.vmem %s3715_s9, 2048  ;;  %p3437_p4 = scmp.lt.s32.totalorder %s3715_s9, %s3715_s9 }
  0x5a   : > { %p3430_p5 = scmp.ne.s32.totalorder %s3715_s9, %s3429_s30  ;;  %p3438_p10 = scmp.lt.s32.totalorder %s3429_s30, %s3429_s30 }
  0x5c   : > { %p3432_p7 = pnand %p3430_p5, %p3725_p8  ;;  %p3439_p11 = por %p3438_p10, %p3437_p4 }
  0x5e   : > { %p3433_p9 = pneg %p3432_p7 }
  0x60   : > { %p3440_p12 = pnand %p3439_p11, %p3433_p9 }
  0x62   : > { %3443 = shalt.err (!%p3440_p12)
}
  0x63   : > { %3256 = dma.hbm_to_vmem [thread:$0]  (!%p3709_p6), %s4425_s4, 2048, %s3715_s9, [#allocation9], %s3619_s19, %s3619_s19, %s3620_s20  }
  0x64   : > { %s3621_s26 = smov [#allocation11]   ;;  %s3444_s29 = scalar_lea.hbm %s4411_s5, 16 }
  0x65   : > { %s246_s17 = sshll.u32 %s3621_s26, 4  ;;  %p3445_p13 = scmp.ne.s32.totalorder %s4411_s5, %s3444_s29  ;;  %s247_s17 = int_to_ptr.vmem [resolvable:$true] %s246_s17 }
  0x66   : > { %p3451_p5 = scmp.lt.u32.totalorder %s3444_s29, %s4411_s5 }
  0x67   : > { %p3447_p0 = pnand %p3445_p13, %p3725_p8 }
  0x69   : > { %p3448_p2 = pneg %p3447_p0 }
  0x6b   : > { %p3453_p7 = pnand %p3451_p5, %p3448_p2 }
  0x6d   : > { %3456 = shalt.err (!%p3453_p7)
}
  0x6e   : > { %s3457_s9 = scalar_lea.vmem %s247_s17, 16  ;;  %s3464_s19 = scalar_lea.vmem %s247_s17, 32 }
  0x6f   : > { %p3458_p9 = scmp.ne.s32.totalorder %s247_s17, %s3457_s9  ;;  %p3465_p11 = scmp.lt.s32.totalorder %s247_s17, %s247_s17 }
  0x70   : > { %p3466_p12 = scmp.lt.s32.totalorder %s3464_s19, %s3457_s9 }
  0x71   : > { %p3460_p4 = pnand %p3458_p9, %p3725_p8 }
  0x72   : > { %p3467_p1 = por %p3466_p12, %p3465_p11 }
  0x73   : > { %p3461_p10 = pneg %p3460_p4 }
  0x75   : > { %p3468_p3 = pnand %p3467_p1, %p3461_p10 }
  0x77   : > { %3471 = shalt.err (!%p3468_p3)
}
  0x78   : > { %3259 = dma.hbm_to_vmem [thread:$0]  (!%p3709_p6), %s4411_s5, 16, %s247_s17, [#allocation12]  }
  0x79   : > { %s1876_s15 = sadd.s32 4294967294, %s3614_s24   ;;  %s3821_s7 = sadd.s32 1, %s3614_s24  }
  0x7a   : > { %s31_s30 = ssub.s32 %s3614_s24, %s3821_s7  ;;  %s34_s14 = sadd.s32 1, %s3610_s23 }
  0x7b   : > { %p32_p1 = scmp.eq.s32.totalorder %s31_s30, 0  ;;  %p41_p3 = scmp.ne.s32.totalorder %s3610_s23, %s3606_s22 }
  0x7c   : > { %p42_p8 = scmp.eq.s32.totalorder %s3614_s24, 0  ;;  %p47_p13 = scmp.ne.s32.totalorder %s3606_s22, %s3602_s21 }
  0x7d   : > { %s3832_s16 = scalar_select %p32_p1, %s3610_s23, %s34_s14  }
  0x7e   : > { %p3834_p0 = por %p42_p8, %p41_p3  ;;  %p4427_p2 = scmp.eq.s32.totalorder %s3693_s27, 0 }
  0x7f   : > { %p181_p5 = scmp.eq.s32.totalorder %s3693_s27, 1  ;;  %p187_p7 = scmp.eq.s32.totalorder %s1876_s15, 1 }
  0x80   : > { %p3840_p6 = por %p4427_p2, %p47_p13  ;;  %p3275_p9 = scmp.lt.s32.totalorder %s3614_s24, 2 }
  0x81   : > { %s257_s18 = sand.u32 1, %s3610_s23   ;;  %p3847_p4 = por %p181_p5, %p41_p3 }
  0x82   : > { %s4428_s17 = scalar_select %p3840_p6, 1, 0 }
  0x83   : > { %s4429_s25 = scalar_select %p3847_p4, 1, 0 }
  0x84   : > { %p3851_p10 = por %p187_p7, %p47_p13  ;;  %s3855_s8 = sshll.u32 %s257_s18, 3 }
  0x85   : > { %s1884_s10 = sshll.u32 %s3614_s24, 7  ;;  %s261_s19 = scalar_lea.vmem [#allocation2], %s3855_s8 }
  0x86   : > { %s4430_s29 = scalar_select %p3851_p10, 1, 0 }
  0x87   : > { %s3861_s9 = scalar_lea.hbm %s4406_s0, %s1884_s10  ;;  %s268_s20 = sshll.u32 %s261_s19, 4  ;;  %s3864_s20 = int_to_ptr.vmem [resolvable:$true] %s268_s20 }
  0x88   : > { %p3868_p11 = pnand %p3275_p9, %p3834_p0  ;;  %s3875_s14 = scalar_lea.hbm %s4407_s1, %s1884_s10 }
  0x89   : > { %s275_s11 = sand.u32 1, %s3614_s24   ;;  %s258_s12 = scalar_lea.sflag [#allocation3], %s257_s18 }
  0x8a   : > { %s3472_s2 = scalar_lea.hbm %s3861_s9, 128  ;;  %p3474_p1 = pneg %p3868_p11 }
  0x8b   : > { %p3473_p12 = scmp.ne.s32.totalorder %s3861_s9, %s3472_s2  ;;  %s3477_s3 = scalar_lea.hbm %s4406_s0, 256 }
  0x8c   : > { %p3478_p13 = scmp.lt.u32.totalorder %s3861_s9, %s4406_s0  ;;  %p3479_p0 = scmp.lt.u32.totalorder %s3477_s3, %s3472_s2 }
  0x8d   : > { %p3475_p3 = pnand %p3474_p1, %p3473_p12  ;;  %p3481_p5 = scmp.lt.u32.totalorder %s3472_s2, %s3861_s9 }
  0x8e   : > { %p3480_p2 = por %p3479_p0, %p3478_p13 }
  0x8f   : > { %p3476_p8 = pneg %p3475_p3 }
  0x90   : > { %p3482_p7 = por %p3481_p5, %p3480_p2 }
  0x92   : > { %p3483_p9 = pnand %p3482_p7, %p3476_p8 }
  0x94   : > { %3486 = shalt.err (!%p3483_p9)
}
  0x95   : > { %s3487_s18 = scalar_lea.vmem %s3864_s20, 128  ;;  %s3622_s10 = smov [#allocation2]  }
  0x96   : > { %p3488_p12 = scmp.ne.s32.totalorder %s3864_s20, %s3487_s18  ;;  %s3492_s30 = sshll.u32 %s3622_s10, 4  ;;  %s3493_s30 = int_to_ptr.vmem [resolvable:$false] %s3492_s30 }
  0x97   : > { %s3494_s4 = scalar_lea.vmem %s3493_s30, 256  ;;  %p3495_p4 = scmp.lt.s32.totalorder %s3864_s20, %s3493_s30 }
  0x98   : > { %p3490_p3 = pnand %p3488_p12, %p3474_p1  ;;  %p3496_p13 = scmp.lt.s32.totalorder %s3494_s4, %s3487_s18 }
  0x9a   : > { %p3491_p10 = pneg %p3490_p3  ;;  %p3497_p0 = por %p3496_p13, %p3495_p4 }
  0x9c   : > { %p3498_p2 = pnand %p3497_p0, %p3491_p10 }
  0x9e   : > { %3501 = shalt.err (!%p3498_p2)
}
  0x9f   : > { %3263 = dma.hbm_to_vmem [thread:$0]  (!%p3868_p11), %s3861_s9, 128, %s3864_s20, %s258_s12  }
  0xa0   : > { %s279_s2 = scalar_lea.vmem [#allocation5], %s3855_s8  ;;  %s276_s26 = scalar_lea.sflag [#allocation6], %s275_s11 }
  0xa1   : > { %s286_s3 = sshll.u32 %s279_s2, 4  ;;  %s3502_s19 = scalar_lea.hbm %s3875_s14, 128  ;;  %s287_s3 = int_to_ptr.vmem [resolvable:$true] %s286_s3 }
  0xa2   : > { %p3503_p4 = scmp.ne.s32.totalorder %s3875_s14, %s3502_s19  ;;  %s3507_s10 = scalar_lea.hbm %s4407_s1, 256 }
  0xa3   : > { %p3508_p5 = scmp.lt.u32.totalorder %s3875_s14, %s4407_s1  ;;  %p3509_p7 = scmp.lt.u32.totalorder %s3507_s10, %s3502_s19 }
  0xa4   : > { %p3505_p10 = pnand %p3503_p4, %p3474_p1  ;;  %p3511_p12 = scmp.lt.u32.totalorder %s3502_s19, %s3875_s14 }
  0xa5   : > { %p3510_p9 = por %p3509_p7, %p3508_p5 }
  0xa6   : > { %p3506_p8 = pneg %p3505_p10 }
  0xa7   : > { %p3512_p3 = por %p3511_p12, %p3510_p9 }
  0xa9   : > { %p3513_p13 = pnand %p3512_p3, %p3506_p8 }
  0xab   : > { %3516 = shalt.err (!%p3513_p13)
}
  0xac   : > { %s3517_s8 = scalar_lea.vmem %s287_s3, 128  ;;  %s3623_s9 = smov [#allocation5]  }
  0xad   : > { %p3518_p0 = scmp.ne.s32.totalorder %s287_s3, %s3517_s8  ;;  %s3522_s20 = sshll.u32 %s3623_s9, 4  ;;  %s3523_s20 = int_to_ptr.vmem [resolvable:$false] %s3522_s20 }
  0xae   : > { %s3524_s11 = scalar_lea.vmem %s3523_s20, 256  ;;  %p3525_p10 = scmp.lt.s32.totalorder %s287_s3, %s3523_s20 }
  0xaf   : > { %p3520_p2 = pnand %p3518_p0, %p3474_p1  ;;  %p3526_p6 = scmp.lt.s32.totalorder %s3524_s11, %s3517_s8 }
  0xb1   : > { %p3521_p4 = pneg %p3520_p2  ;;  %p3527_p5 = por %p3526_p6, %p3525_p10 }
  0xb3   : > { %p3528_p7 = pnand %p3527_p5, %p3521_p4 }
  0xb5   : > { %3531 = shalt.err (!%p3528_p7)
}
  0xb6   : > { %3266 = dma.hbm_to_vmem [thread:$0]  (!%p3868_p11), %s3875_s14, 128, %s287_s3, %s276_s26  }
  0xb7   : > { %p4432_p8 = scmp.ne.s32.totalorder %s4420_s28, 0 }
  0xb8   : > { %s3928_s12 = sand.u32 (!%p4432_p8), 1, %s3606_s22   ;;  %p4433_p6 = scmp.ne.s32.totalorder (!%p4432_p8), %s4428_s17, 0 }
  0xb9   : > { %295 = sbr.rel (%p4432_p8) target bundleno = 2582 (0xa16), region = 44  ;;  %s3931_s2 = sshll.u32 (!%p4432_p8), %s3928_s12, 3 }
  0xba   : > { %s298_s19 = scalar_lea.sflag (!%p4432_p8), [#allocation3], %s3928_s12  ;;  %s301_s15 = scalar_lea.vmem (!%p4432_p8), [#allocation2], %s3931_s2 }
  0xc0   : > { %3577 = dma.done.wait (%p4433_p6), %s298_s19, 128  }
  0xc1   : > { %3579 = vsyncadd (%p4433_p6), %s298_s19, 4294967168  ;;  %s306_s28 = sand.u32 1, %s3693_s27   ;;  %s310_s14 = scalar_lea.vmem [#allocation5], %s3931_s2 }
  0xc2   : > { %s307_s13 = scalar_lea.sflag [#allocation6], %s306_s28 }
  0xc3   : > { %3581 = dma.done.wait (%p4433_p6), %s307_s13, 128  }
  0xc4   : > { %3583 = vsyncadd (%p4433_p6), %s307_s13, 4294967168  ;;  %p4434_p11 = scmp.eq.s32.totalorder %s3693_s27, 0 }
  0xc6   : > { %3585 = dma.done.wait (%p4434_p11), [#allocation6], 2048   ;;  %p4435_p1 = pmov %p4434_p11 }
  0xc8   : > { %3587 = vsyncadd (%p4435_p1), [#allocation6], 4294965248  ;;  %p4436_p9 = pmov %p4435_p1 }
  0xc9   : > { %p4437_p12 = pmov %p4435_p1 }
  0xca   : > { %3589 = dma.done.wait (%p4436_p9), [#allocation9], 4096  }
  0xcb   : > { %3591 = vsyncadd (%p4437_p12), [#allocation9], 4294963200  ;;  %p4438_p3 = pmov %p4435_p1 }
  0xcc   : > { %p4439_p13 = pmov %p4435_p1 }
  0xcd   : > { %3593 = dma.done.wait (%p4438_p3), [#allocation12], 16  }
  0xce   : > { %3595 = vsyncadd (%p4439_p13), [#allocation12], 4294967280  ;;  %v3624_v0 = vmov 0   ;;  %v3625_v1 = vmov 0.0|0.0   ;;  %vm3626_vm0 = vmmov 0   ;;  %v3627_v2 = vmov 0.0  }
  0xcf   : > { %3331 = vset.pattern.permute.xlu0 %v3624_v0  ;;  %2801 = vmatprep.subr.bf16.mxu0 %v3625_v1  ;;  %v3964_v3 = vld [vmem:[%s301_s15] sm:$0xff]  ;;  %v3966_v4 = vld [vmem:[%s310_s14] sm:$0xff]  ;;  %v3628_v14 = vmov 1   ;;  %v394_v55 = vlaneseq  ;;  %v3629_v58 = vmov 1.0   ;;  %v3630_v60 = vmov 2   ;;  %s1914_s17 = sshll.u32 %s3693_s27, 7 }
  0xd0   : > { %2238 = vmatprep.mubr.msk.f32.mxu0 %vm3626_vm0, %v3627_v2  ;;  %2849 = vmatprep.subr.bf16.mxu1 %v3625_v1  ;;  %v378_v5 = vld [vmem:[#allocation8] sm:$0xff]  ;;  %vm594_vm1 = vcmp.gt.s32.totalorder %v3966_v4, 0  ;;  %v379_v6 = vld [vmem:[#allocation8 + $0x8] sm:$0xff]  ;;  %v380_v7 = vld [vmem:[#allocation8 + $0x10] sm:$0xff]  ;;  %vm742_vm5 = vcmp.gt.s32.totalorder %v3966_v4, 1  ;;  %vm890_vm6 = vcmp.gt.s32.totalorder %v3966_v4, 2  ;;  %s4362_s30 = scalar_lea.hbm %s4412_s6, %s1914_s17 }
  0xd1   : > { %2308 = vmatprep.mubr.msk.f32.mxu1 %vm3626_vm0, %v3627_v2  ;;  %397 = vperm.xlu0 %3331, %v3964_v3   ;;  %v381_v8 = vld [vmem:[#allocation8 + $0x18] sm:$0xff]  ;;  %v595_v9 = vsel %vm594_vm1, 1, %v3624_v0  ;;  %v3971_v10 = vpack.c.bf16 %v379_v6, %v378_v5  ;;  %v382_v12 = vld [vmem:[#allocation8 + $0x20] sm:$0xff]  ;;  %v383_v13 = vld [vmem:[#allocation8 + $0x28] sm:$0xff]  ;;  %v4056_v56 = vand.u32 127, %v394_v55  ;;  %v743_v59 = vsel %vm742_vm5, 1, %v3624_v0 }
  0xd2   : > { %v3974_v11 = vpack.c.bf16 %v381_v8, %v380_v7  ;;  %3332 = vset.pattern.permute.xlu1 %v3628_v14  ;;  %v3981_v15 = vpack.c.bf16 %v383_v13, %v382_v12  ;;  %v384_v16 = vld [vmem:[#allocation8 + $0x30] sm:$0xff]  ;;  %v385_v17 = vld [vmem:[#allocation8 + $0x38] sm:$0xff]  ;;  %v386_v19 = vld [vmem:[#allocation8 + $0x40] sm:$0xff]  ;;  %v891_v61 = vsel %vm890_vm6, 1, %v3624_v0  ;;  %vm1038_vm13 = vcmp.gt.s32.totalorder %v3966_v4, 3  ;;  %s359_s3 = scalar_lea.vmem [#allocation13], %s3931_s2 }
  0xd3   : > { %2803 = vmatpush3.bf16.msra.mxu0 %v3971_v10  ;;  %2851 = vmatpush3.bf16.msra.mxu1 %v3971_v10  ;;  %v3988_v18 = vpack.c.bf16 %v385_v17, %v384_v16  ;;  %v387_v20 = vld [vmem:[#allocation8 + $0x48] sm:$0xff]  ;;  %v388_v22 = vld [vmem:[#allocation8 + $0x50] sm:$0xff]  ;;  %v389_v23 = vld [vmem:[#allocation8 + $0x58] sm:$0xff]  ;;  %vm400_vm2 = vcmp.eq.s32.totalorder %v4056_v56, 127  ;;  %s1745_s26 = sshll.u32 %s359_s3, 4  ;;  %s1732_s4 = scalar_lea.sflag [#allocation4], %s3928_s12  ;;  %s4364_s26 = int_to_ptr.vmem [resolvable:$true] %s1745_s26 }
  0xd4   : > { %2804 = vmatprep.subr.bf16.mxu0 %v3625_v1  ;;  %2852 = vmatprep.subr.bf16.mxu1 %v3625_v1  ;;  %v3994_v21 = vpack.c.bf16 %v387_v20, %v386_v19  ;;  %v4000_v24 = vpack.c.bf16 %v389_v23, %v388_v22  ;;  %v390_v25 = vld [vmem:[#allocation8 + $0x60] sm:$0xff]  ;;  %v391_v26 = vld [vmem:[#allocation8 + $0x68] sm:$0xff]  ;;  %v392_v28 = vld [vmem:[#allocation8 + $0x70] sm:$0xff]  ;;  %v1039_v20 = vsel %vm1038_vm13, 1, %v3624_v0  ;;  %v3632_v22 = vmov 4   ;;  %s3532_s8 = scalar_lea.vmem %s4364_s26, 128 }
  0xd5   : > { %597 = vperm.xlu0 %3331, %v595_v9   ;;  %405 = vperm.xlu1 %3332, %v3964_v3   ;;  %v4006_v27 = vpack.c.bf16 %v391_v26, %v390_v25  ;;  %v393_v29 = vld [vmem:[#allocation8 + $0x78] sm:$0xff]  ;;  %v362_v31 = vld [vmem:[#allocation7] sm:$0xff]  ;;  %v363_v32 = vld [vmem:[#allocation7 + $0x8] sm:$0xff]  ;;  %v3631_v9 = vmov 3   ;;  %p3533_p0 = scmp.ne.s32.totalorder %s4364_s26, %s3532_s8  ;;  %p4440_p2 = scmp.ne.s32.totalorder %s4429_s25, 0 }
  0xd6   : > { %v4012_v30 = vpack.c.bf16 %v393_v29, %v392_v28  ;;  %v4018_v33 = vpack.c.bf16 %v363_v32, %v362_v31  ;;  %v364_v34 = vld [vmem:[#allocation7 + $0x10] sm:$0xff]  ;;  %v365_v35 = vld [vmem:[#allocation7 + $0x18] sm:$0xff]  ;;  %v366_v37 = vld [vmem:[#allocation7 + $0x20] sm:$0xff]  ;;  %s3636_s27 = smov [#allocation13]  }
  0xd7   : > { %2806 = vmatpush3.bf16.msra.mxu0 %v3974_v11  ;;  %2854 = vmatpush3.bf16.msra.mxu1 %v3974_v11  ;;  %v4025_v36 = vpack.c.bf16 %v365_v35, %v364_v34  ;;  %v367_v38 = vld [vmem:[#allocation7 + $0x28] sm:$0xff]  ;;  %v368_v40 = vld [vmem:[#allocation7 + $0x30] sm:$0xff]  ;;  %v369_v41 = vld [vmem:[#allocation7 + $0x38] sm:$0xff]  ;;  %v3633_v34 = vmov 5   ;;  %p3534_p4 = pnand %p3533_p0, %p4440_p2  ;;  %s3536_s9 = sshll.u32 %s3636_s27, 4  ;;  %s3537_s9 = int_to_ptr.vmem [resolvable:$false] %s3536_s9 }
  0xd8   : > { %2807 = vmatprep.subr.bf16.mxu0 %v3625_v1  ;;  %2855 = vmatprep.subr.bf16.mxu1 %v3625_v1  ;;  %v4031_v39 = vpack.c.bf16 %v367_v38, %v366_v37  ;;  %v4035_v42 = vpack.c.bf16 %v369_v41, %v368_v40  ;;  %v370_v43 = vld [vmem:[#allocation7 + $0x40] sm:$0xff]  ;;  %v371_v44 = vld [vmem:[#allocation7 + $0x48] sm:$0xff]  ;;  %v372_v46 = vld [vmem:[#allocation7 + $0x50] sm:$0xff]  ;;  %s3538_s20 = scalar_lea.vmem %s3537_s9, 256  ;;  %p3539_p5 = scmp.lt.s32.totalorder %s4364_s26, %s3537_s9 }
  0xd9   : > { %3333 = vset.pattern.permute.xlu1 %v3624_v0  ;;  %v4039_v45 = vpack.c.bf16 %v371_v44, %v370_v43  ;;  %v373_v47 = vld [vmem:[#allocation7 + $0x58] sm:$0xff]  ;;  %v374_v49 = vld [vmem:[#allocation7 + $0x60] sm:$0xff]  ;;  %v375_v50 = vld [vmem:[#allocation7 + $0x68] sm:$0xff]  ;;  %3334 = vset.pattern.permute.xlu0 %v3630_v60  ;;  %p3535_p10 = pneg %p3534_p4  ;;  %p3540_p7 = scmp.lt.s32.totalorder %s3538_s20, %s3532_s8 }
  0xda   : > { %v4043_v48 = vpack.c.bf16 %v373_v47, %v372_v46  ;;  %v4047_v51 = vpack.c.bf16 %v375_v50, %v374_v49  ;;  %v376_v52 = vld [vmem:[#allocation7 + $0x70] sm:$0xff]  ;;  %v377_v53 = vld [vmem:[#allocation7 + $0x78] sm:$0xff]  ;;  %745 = vperm.xlu1 %3333, %v743_v59   ;;  %412 = vperm.xlu0 %3334, %v3964_v3   ;;  %v3634_v46 = vmov 6  }
  0xdb   : > { %2809 = vmatpush3.bf16.msra.mxu0 %v3981_v15  ;;  %2857 = vmatpush3.bf16.msra.mxu1 %v3981_v15  ;;  %v4051_v54 = vpack.c.bf16 %v377_v53, %v376_v52  ;;  %v1639_v59 = vld [vmem:[#allocation10 + $0x10] sm:$0xff]  ;;  %p3541_p8 = por %p3540_p7, %p3539_p5 }
  0xdc   : > { %2810 = vmatprep.subr.bf16.mxu0 %v3625_v1  ;;  %2858 = vmatprep.subr.bf16.mxu1 %v3625_v1 }
  0xdd   : > { %p3542_p6 = pnand %p3541_p8, %p3535_p10 }
  0xde   : > { %893 = vperm.xlu1 %3333, %v891_v61   ;;  %3336 = vset.pattern.permute.xlu0 %v3624_v0 }
  0xdf   : > { %2812 = vmatpush3.bf16.msra.mxu0 %v3988_v18  ;;  %2860 = vmatpush3.bf16.msra.mxu1 %v3988_v18 }
  0xe0   : > { %2813 = vmatprep.subr.bf16.mxu0 %v3625_v1  ;;  %2861 = vmatprep.subr.bf16.mxu1 %v3625_v1 }
  0xe1   : > { %1041 = vperm.xlu0 %3336, %v1039_v20  }
  0xe2   : > { %3335 = vset.pattern.permute.xlu1 %v3631_v9 }
  0xe3   : > { %2815 = vmatpush3.bf16.msra.mxu0 %v3994_v21  ;;  %2863 = vmatpush3.bf16.msra.mxu1 %v3994_v21 }
  0xe4   : > { %2816 = vmatprep.subr.bf16.mxu0 %v3625_v1  ;;  %2864 = vmatprep.subr.bf16.mxu1 %v3625_v1 }
  0xe5   : > { %419 = vperm.xlu1 %3335, %v3964_v3   ;;  %3339 = vset.pattern.permute.xlu0 %v3633_v34 }
  0xe6   : > { %433 = vperm.xlu0 %3339, %v3964_v3  }
  0xe7   : > { %2818 = vmatpush3.bf16.msra.mxu0 %v4000_v24  ;;  %2866 = vmatpush3.bf16.msra.mxu1 %v4000_v24 }
  0xe8   : > { %2819 = vmatprep.subr.bf16.mxu0 %v3625_v1  ;;  %2867 = vmatprep.subr.bf16.mxu1 %v3625_v1 }
  0xe9   : > { %3337 = vset.pattern.permute.xlu1 %v3632_v22 }
  0xea   : > { %426 = vperm.xlu1 %3337, %v3964_v3   ;;  %3341 = vset.pattern.permute.xlu0 %v3624_v0 }
  0xeb   : > { %2821 = vmatpush3.bf16.msra.mxu0 %v4006_v27  ;;  %2869 = vmatpush3.bf16.msra.mxu1 %v4006_v27 }
  0xec   : > { %2822 = vmatprep.subr.bf16.mxu0 %v3625_v1  ;;  %2870 = vmatprep.subr.bf16.mxu1 %v3625_v1 }
  0xee   : > { %3338 = vset.pattern.permute.xlu1 %v3624_v0 }
  0xef   : > { %2824 = vmatpush3.bf16.msra.mxu0 %v4012_v30  ;;  %2872 = vmatpush3.bf16.msra.mxu1 %v4012_v30 }
  0xf0   : > { %2825 = vmatprep.subr.bf16.mxu0 %v3625_v1  ;;  %2873 = vmatprep.subr.bf16.mxu1 %v3625_v1 }
  0xf2   : > { %2239 = vmatmul.mubr.f32.vlgmr.msra.gmra.mrb[0].mxu0 %v3627_v2 }
  0xf3   : > { %2827 = vmatpush3.bf16.msra.mxu0 %v4018_v33  ;;  %2273 = vmatprep.mubr.msk.f32.mxu0 %vm3626_vm0, %v3627_v2 }
  0xf4   : > { %2828 = vmatprep.subr.bf16.mxu0 %v3625_v1 }
  0xf7   : > { %2830 = vmatpush3.bf16.msra.mxu0 %v4025_v36 }
  0xf8   : > { %2831 = vmatprep.subr.bf16.mxu0 %v3625_v1 }
  0xfb   : > { %2833 = vmatpush3.bf16.msra.mxu0 %v4031_v39 }
  0xfc   : > { %2834 = vmatprep.subr.bf16.mxu0 %v3625_v1 }
  0xff   : > { %2836 = vmatpush3.bf16.msra.mxu0 %v4035_v42 }
 0x100   : > { %2837 = vmatprep.subr.bf16.mxu0 %v3625_v1 }
 0x103   : > { %2839 = vmatpush3.bf16.msra.mxu0 %v4039_v45 }
 0x104   : > { %2840 = vmatprep.subr.bf16.mxu0 %v3625_v1 }
 0x107   : > { %2842 = vmatpush3.bf16.msra.mxu0 %v4043_v48 }
 0x108   : > { %2843 = vmatprep.subr.bf16.mxu0 %v3625_v1 }
 0x10b   : > { %2845 = vmatpush3.bf16.msra.mxu0 %v4047_v51 }
 0x10c   : > { %2846 = vmatprep.subr.bf16.mxu0 %v3625_v1 }
 0x10f   : > { %2848 = vmatpush3.bf16.msra.mxu0 %v4051_v54 }
 0x110   : > { %2897 = vmatprep.subr.bf16.mxu0 %v3625_v1 }
 0x150   : > { %v398_v57 = vpop.permute.xlu0 %397 }
 0x151   : > { %vm399_vm3 = vcmp.eq.s32.totalorder %v4056_v56, %v398_v57  ;;  %v1638_v57 = vld [vmem:[#allocation10 + $0x8] sm:$0xff] }
 0x152   : > { %vm401_vm4 = vmor %vm399_vm3, %vm400_vm2  ;;  %vm1186_vm3 = vcmp.gt.s32.totalorder %v3966_v4, 4 }
 0x153   : > { %2274 = vmatmul.mubr.msk.f32.vlgmr.msra.gmra.mrb[0].mxu0 %vm401_vm4, %v3629_v58  ;;  %vm1334_vm4 = vcmp.gt.s32.totalorder %v3966_v4, 5  ;;  %v1187_v32 = vsel %vm1186_vm3, 1, %v3624_v0 }
 0x154   : > { %2899 = vmatpush3.bf16.msra.mxu0 %v3971_v10  ;;  %2378 = vmatprep.mubr.msk.f32.mxu0 %vm3626_vm0, %v3627_v2  ;;  %v598_v5 = vpop.permute.xlu0 %597  ;;  %v406_v8 = vpop.permute.xlu1 %405  ;;  %v1335_v35 = vsel %vm1334_vm4, 1, %v3624_v0 }
 0x155   : > { %2900 = vmatprep.subr.bf16.mxu0 %v3625_v1  ;;  %vm599_vm7 = vcmp.eq.s32.totalorder %v598_v5, 1  ;;  %vm407_vm8 = vcmp.eq.s32.totalorder %v4056_v56, %v406_v8  ;;  %1189 = vperm.xlu1 %3338, %v1187_v32   ;;  %v1641_v5 = vld [vmem:[#allocation10 + $0x20] sm:$0xff]  ;;  %v1643_v8 = vld [vmem:[#allocation10 + $0x30] sm:$0xff] }
 0x156   : > { %vm408_vm9 = vmor %vm407_vm8, %vm400_vm2 }
 0x158   : > { %2902 = vmatpush3.bf16.msra.mxu0 %v3974_v11 }
 0x159   : > { %2903 = vmatprep.subr.bf16.mxu0 %v3625_v1  ;;  %v746_v14 = vpop.permute.xlu1 %745  ;;  %v413_v19 = vpop.permute.xlu0 %412  ;;  %1337 = vperm.xlu1 %3338, %v1335_v35  }
 0x15a   : > { %vm747_vm10 = vcmp.eq.s32.totalorder %v746_v14, 1  ;;  %vm414_vm11 = vcmp.eq.s32.totalorder %v4056_v56, %v413_v19 }
 0x15b   : > { %vm415_vm12 = vmor %vm414_vm11, %vm400_vm2  ;;  %vm1482_vm11 = vcmp.gt.s32.totalorder %v3966_v4, 6 }
 0x15c   : > { %2905 = vmatpush3.bf16.msra.mxu0 %v3981_v15 }
 0x15d   : > { %2906 = vmatprep.subr.bf16.mxu0 %v3625_v1  ;;  %v894_v26 = vpop.permute.xlu1 %893  ;;  %3340 = vset.pattern.permute.xlu1 %v3634_v46 }
 0x15e   : > { %vm895_vm14 = vcmp.eq.s32.totalorder %v894_v26, 1  ;;  %440 = vperm.xlu1 %3340, %v3964_v3  }
 0x160   : > { %2908 = vmatpush3.bf16.msra.mxu0 %v3988_v18  ;;  %v1042_v40 = vpop.permute.xlu0 %1041 }
 0x161   : > { %2909 = vmatprep.subr.bf16.mxu0 %v3625_v1  ;;  %vm1043_vm5 = vcmp.eq.s32.totalorder %v1042_v40, 1 }
 0x164   : > { %2911 = vmatpush3.bf16.msra.mxu0 %v3994_v21  ;;  %v420_v31 = vpop.permute.xlu1 %419 }
 0x165   : > { %2912 = vmatprep.subr.bf16.mxu0 %v3625_v1  ;;  %vm421_vm15 = vcmp.eq.s32.totalorder %v4056_v56, %v420_v31  ;;  %v434_v55 = vpop.permute.xlu0 %433 }
 0x166   : > { %vm422_vm1 = vmor %vm421_vm15, %vm400_vm2  ;;  %vm1630_vm15 = vcmp.gt.s32.totalorder %v3966_v4, 7  ;;  %v1644_v4 = vld [vmem:[#allocation10 + $0x38] sm:$0xff] }
 0x167   : > { %v1631_v60 = vsel %vm1630_vm15, 1, %v3624_v0  ;;  %v3195_v9 = vpack.c.bf16 %v1644_v4, %v1643_v8 }
 0x168   : > { %2914 = vmatpush3.bf16.msra.mxu0 %v4000_v24 }
 0x169   : > { %2915 = vmatprep.subr.bf16.mxu0 %v3625_v1  ;;  %v427_v44 = vpop.permute.xlu1 %426 }
 0x16a   : > { %vm428_vm6 = vcmp.eq.s32.totalorder %v4056_v56, %v427_v44 }
 0x16c   : > { %2917 = vmatpush3.bf16.msra.mxu0 %v4006_v27 }
 0x16d   : > { %2918 = vmatprep.subr.bf16.mxu0 %v3625_v1 }
 0x170   : > { %2920 = vmatpush3.bf16.msra.mxu0 %v4012_v30 }
 0x171   : > { %2921 = vmatprep.subr.bf16.mxu0 %v3625_v1 }
 0x1d4   : > { %v1190_v50 = vpop.permute.xlu1 %1189 }
 0x1d5   : > { %vm1191_vm8 = vcmp.eq.s32.totalorder %v1190_v50, 1 }
 0x226   : > { %v589_v62 = vpop.f32.mrb[0].mxu0 }
 0x227   : > { %3344 = vtanh.f32 %v589_v62  ;;  %v2275_v63 = vpop.f32.mrb[1].mxu0  ;;  %v1640_v62 = vld [vmem:[#allocation10 + $0x18] sm:$0xff] }
 0x228   : > { %v3189_v63 = vpack.c.bf16 %v1640_v62, %v1639_v59 }
 0x231   : > { %v3345_v6 = vpop.eup %3344 }
 0x232   : > { %2309 = vmatmul.mubr.msk.f32.vlgmr.msra.gmra.mrb[0].mxu1 %vm599_vm7, %v3345_v6  ;;  %v600_v7 = vsel %vm599_vm7, %v3345_v6, 0.0  ;;  %vm429_vm7 = vmor %vm428_vm6, %vm400_vm2  ;;  %v1642_v6 = vld [vmem:[#allocation10 + $0x28] sm:$0xff] }
 0x233   : > { %2875 = vmatpush3.bf16.msra.mxu1 %v4018_v33  ;;  %2343 = vmatprep.mubr.msk.f32.mxu1 %vm3626_vm0, %v3627_v2 }
 0x234   : > { %2876 = vmatprep.subr.bf16.mxu1 %v3625_v1 }
 0x237   : > { %2878 = vmatpush3.bf16.msra.mxu1 %v4025_v36 }
 0x238   : > { %2879 = vmatprep.subr.bf16.mxu1 %v3625_v1 }
 0x23b   : > { %2881 = vmatpush3.bf16.msra.mxu1 %v4031_v39 }
 0x23c   : > { %2882 = vmatprep.subr.bf16.mxu1 %v3625_v1 }
 0x23f   : > { %2884 = vmatpush3.bf16.msra.mxu1 %v4035_v42 }
 0x240   : > { %2885 = vmatprep.subr.bf16.mxu1 %v3625_v1 }
 0x243   : > { %2887 = vmatpush3.bf16.msra.mxu1 %v4039_v45 }
 0x244   : > { %2888 = vmatprep.subr.bf16.mxu1 %v3625_v1 }
 0x247   : > { %2890 = vmatpush3.bf16.msra.mxu1 %v4043_v48 }
 0x248   : > { %2891 = vmatprep.subr.bf16.mxu1 %v3625_v1 }
 0x24b   : > { %2893 = vmatpush3.bf16.msra.mxu1 %v4047_v51 }
 0x24c   : > { %2894 = vmatprep.subr.bf16.mxu1 %v3625_v1 }
 0x24f   : > { %2896 = vmatpush3.bf16.msra.mxu1 %v4051_v54 }
 0x250   : > { %2945 = vmatprep.subr.bf16.mxu1 %v3625_v1 }
 0x252   : > { %2344 = vmatmul.mubr.msk.f32.vlgmr.msra.gmra.mrb[0].mxu1 %vm408_vm9, %v3629_v58  ;;  %vm435_vm9 = vcmp.eq.s32.totalorder %v4056_v56, %v434_v55 }
 0x253   : > { %2947 = vmatpush3.bf16.msra.mxu1 %v3971_v10  ;;  %2448 = vmatprep.mubr.msk.f32.mxu1 %vm3626_vm0, %v3627_v2 }
 0x254   : > { %2948 = vmatprep.subr.bf16.mxu1 %v3625_v1 }
 0x257   : > { %2950 = vmatpush3.bf16.msra.mxu1 %v3974_v11 }
 0x258   : > { %2951 = vmatprep.subr.bf16.mxu1 %v3625_v1 }
 0x25b   : > { %2953 = vmatpush3.bf16.msra.mxu1 %v3981_v15 }
 0x25c   : > { %2954 = vmatprep.subr.bf16.mxu1 %v3625_v1 }
 0x25f   : > { %2956 = vmatpush3.bf16.msra.mxu1 %v3988_v18 }
 0x260   : > { %2957 = vmatprep.subr.bf16.mxu1 %v3625_v1 }
 0x263   : > { %2959 = vmatpush3.bf16.msra.mxu1 %v3994_v21 }
 0x264   : > { %2960 = vmatprep.subr.bf16.mxu1 %v3625_v1 }
 0x267   : > { %2962 = vmatpush3.bf16.msra.mxu1 %v4000_v24 }
 0x268   : > { %2963 = vmatprep.subr.bf16.mxu1 %v3625_v1 }
 0x26b   : > { %2965 = vmatpush3.bf16.msra.mxu1 %v4006_v27 }
 0x26c   : > { %2966 = vmatprep.subr.bf16.mxu1 %v3625_v1 }
 0x26f   : > { %2968 = vmatpush3.bf16.msra.mxu1 %v4012_v30 }
 0x270   : > { %2969 = vmatprep.subr.bf16.mxu1 %v3625_v1 }
 0x325   : > { %v737_v12 = vpop.f32.mrb[0].mxu1 }
 0x326   : > { %3346 = vtanh.f32 %v737_v12  ;;  %v2345_v13 = vpop.f32.mrb[1].mxu1  ;;  %v1646_v12 = vld [vmem:[#allocation10 + $0x48] sm:$0xff] }
 0x330   : > { %v3347_v16 = vpop.eup %3346 }
 0x331   : > { %v748_v17 = vsel %vm747_vm10, %v3347_v16, %v600_v7  ;;  %vm436_vm10 = vmor %vm435_vm9, %vm400_vm2  ;;  %v3192_v7 = vpack.c.bf16 %v1642_v6, %v1641_v5 }
 0x332   : > { %2379 = vmatmul.mubr.f32.vlgmr.msra.gmra.mrb[2].mxu0 %v748_v17 }
 0x333   : > { %2923 = vmatpush3.bf16.msra.mxu0 %v4018_v33  ;;  %2413 = vmatprep.mubr.msk.f32.mxu0 %vm3626_vm0, %v3627_v2 }
 0x334   : > { %2924 = vmatprep.subr.bf16.mxu0 %v3625_v1 }
 0x337   : > { %2926 = vmatpush3.bf16.msra.mxu0 %v4025_v36 }
 0x338   : > { %2927 = vmatprep.subr.bf16.mxu0 %v3625_v1 }
 0x33b   : > { %2929 = vmatpush3.bf16.msra.mxu0 %v4031_v39 }
 0x33c   : > { %2930 = vmatprep.subr.bf16.mxu0 %v3625_v1 }
 0x33f   : > { %2932 = vmatpush3.bf16.msra.mxu0 %v4035_v42 }
 0x340   : > { %2933 = vmatprep.subr.bf16.mxu0 %v3625_v1 }
 0x343   : > { %2935 = vmatpush3.bf16.msra.mxu0 %v4039_v45 }
 0x344   : > { %2936 = vmatprep.subr.bf16.mxu0 %v3625_v1 }
 0x347   : > { %2938 = vmatpush3.bf16.msra.mxu0 %v4043_v48 }
 0x348   : > { %2939 = vmatprep.subr.bf16.mxu0 %v3625_v1 }
 0x34b   : > { %2941 = vmatpush3.bf16.msra.mxu0 %v4047_v51 }
 0x34c   : > { %2942 = vmatprep.subr.bf16.mxu0 %v3625_v1 }
 0x34f   : > { %2944 = vmatpush3.bf16.msra.mxu0 %v4051_v54 }
 0x350   : > { %2993 = vmatprep.subr.bf16.mxu0 %v3625_v1 }
 0x352   : > { %2414 = vmatmul.mubr.msk.f32.vlgmr.msra.gmra.mrb[2].mxu0 %vm415_vm12, %v3629_v58 }
 0x353   : > { %2995 = vmatpush3.bf16.msra.mxu0 %v3971_v10  ;;  %2518 = vmatprep.mubr.msk.f32.mxu0 %vm3626_vm0, %v3627_v2 }
 0x354   : > { %2996 = vmatprep.subr.bf16.mxu0 %v3625_v1 }
 0x357   : > { %2998 = vmatpush3.bf16.msra.mxu0 %v3974_v11 }
 0x358   : > { %2999 = vmatprep.subr.bf16.mxu0 %v3625_v1 }
 0x35b   : > { %3001 = vmatpush3.bf16.msra.mxu0 %v3981_v15 }
 0x35c   : > { %3002 = vmatprep.subr.bf16.mxu0 %v3625_v1 }
 0x35f   : > { %3004 = vmatpush3.bf16.msra.mxu0 %v3988_v18 }
 0x360   : > { %3005 = vmatprep.subr.bf16.mxu0 %v3625_v1 }
 0x363   : > { %3007 = vmatpush3.bf16.msra.mxu0 %v3994_v21 }
 0x364   : > { %3008 = vmatprep.subr.bf16.mxu0 %v3625_v1 }
 0x367   : > { %3010 = vmatpush3.bf16.msra.mxu0 %v4000_v24 }
 0x368   : > { %3011 = vmatprep.subr.bf16.mxu0 %v3625_v1 }
 0x36b   : > { %3013 = vmatpush3.bf16.msra.mxu0 %v4006_v27 }
 0x36c   : > { %3014 = vmatprep.subr.bf16.mxu0 %v3625_v1 }
 0x36f   : > { %3016 = vmatpush3.bf16.msra.mxu0 %v4012_v30 }
 0x370   : > { %3017 = vmatprep.subr.bf16.mxu0 %v3625_v1 }
 0x425   : > { %v885_v23 = vpop.f32.mrb[2].mxu0 }
 0x426   : > { %3348 = vtanh.f32 %v885_v23  ;;  %v2415_v25 = vpop.f32.mrb[3].mxu0 }
 0x430   : > { %v3349_v28 = vpop.eup %3348 }
 0x431   : > { %v896_v29 = vsel %vm895_vm14, %v3349_v28, %v748_v17  ;;  %v1912_v28 = vld [vmem:[#allocation11] ss:$0 sm:$0xff] }
 0x432   : > { %2449 = vmatmul.mubr.f32.vlgmr.msra.gmra.mrb[2].mxu1 %v896_v29 }
 0x433   : > { %2971 = vmatpush3.bf16.msra.mxu1 %v4018_v33  ;;  %2483 = vmatprep.mubr.msk.f32.mxu1 %vm3626_vm0, %v3627_v2 }
 0x434   : > { %2972 = vmatprep.subr.bf16.mxu1 %v3625_v1 }
 0x437   : > { %2974 = vmatpush3.bf16.msra.mxu1 %v4025_v36 }
 0x438   : > { %2975 = vmatprep.subr.bf16.mxu1 %v3625_v1 }
 0x43b   : > { %2977 = vmatpush3.bf16.msra.mxu1 %v4031_v39 }
 0x43c   : > { %2978 = vmatprep.subr.bf16.mxu1 %v3625_v1 }
 0x43f   : > { %2980 = vmatpush3.bf16.msra.mxu1 %v4035_v42 }
 0x440   : > { %2981 = vmatprep.subr.bf16.mxu1 %v3625_v1 }
 0x443   : > { %2983 = vmatpush3.bf16.msra.mxu1 %v4039_v45 }
 0x444   : > { %2984 = vmatprep.subr.bf16.mxu1 %v3625_v1 }
 0x447   : > { %2986 = vmatpush3.bf16.msra.mxu1 %v4043_v48 }
 0x448   : > { %2987 = vmatprep.subr.bf16.mxu1 %v3625_v1 }
 0x44b   : > { %2989 = vmatpush3.bf16.msra.mxu1 %v4047_v51 }
 0x44c   : > { %2990 = vmatprep.subr.bf16.mxu1 %v3625_v1 }
 0x44f   : > { %2992 = vmatpush3.bf16.msra.mxu1 %v4051_v54 }
 0x450   : > { %3041 = vmatprep.subr.bf16.mxu1 %v3625_v1 }
 0x452   : > { %2484 = vmatmul.mubr.msk.f32.vlgmr.msra.gmra.mrb[2].mxu1 %vm422_vm1, %v3629_v58 }
 0x453   : > { %3043 = vmatpush3.bf16.msra.mxu1 %v3971_v10  ;;  %2588 = vmatprep.mubr.msk.f32.mxu1 %vm3626_vm0, %v3627_v2 }
 0x454   : > { %3044 = vmatprep.subr.bf16.mxu1 %v3625_v1 }
 0x457   : > { %3046 = vmatpush3.bf16.msra.mxu1 %v3974_v11 }
 0x458   : > { %3047 = vmatprep.subr.bf16.mxu1 %v3625_v1 }
 0x45b   : > { %3049 = vmatpush3.bf16.msra.mxu1 %v3981_v15 }
 0x45c   : > { %3050 = vmatprep.subr.bf16.mxu1 %v3625_v1 }
 0x45f   : > { %3052 = vmatpush3.bf16.msra.mxu1 %v3988_v18 }
 0x460   : > { %3053 = vmatprep.subr.bf16.mxu1 %v3625_v1 }
 0x463   : > { %3055 = vmatpush3.bf16.msra.mxu1 %v3994_v21 }
 0x464   : > { %3056 = vmatprep.subr.bf16.mxu1 %v3625_v1 }
 0x467   : > { %3058 = vmatpush3.bf16.msra.mxu1 %v4000_v24 }
 0x468   : > { %3059 = vmatprep.subr.bf16.mxu1 %v3625_v1 }
 0x46b   : > { %3061 = vmatpush3.bf16.msra.mxu1 %v4006_v27 }
 0x46c   : > { %3062 = vmatprep.subr.bf16.mxu1 %v3625_v1 }
 0x46f   : > { %3064 = vmatpush3.bf16.msra.mxu1 %v4012_v30 }
 0x470   : > { %3065 = vmatprep.subr.bf16.mxu1 %v3625_v1 }
 0x525   : > { %v1033_v37 = vpop.f32.mrb[2].mxu1 }
 0x526   : > { %3350 = vtanh.f32 %v1033_v37  ;;  %v2485_v38 = vpop.f32.mrb[3].mxu1 }
 0x530   : > { %v3351_v41 = vpop.eup %3350 }
 0x531   : > { %v1044_v43 = vsel %vm1043_vm5, %v3351_v41, %v896_v29 }
 0x532   : > { %2519 = vmatmul.mubr.f32.vlgmr.msra.gmra.mrb[4].mxu0 %v1044_v43 }
 0x533   : > { %3019 = vmatpush3.bf16.msra.mxu0 %v4018_v33  ;;  %2553 = vmatprep.mubr.msk.f32.mxu0 %vm3626_vm0, %v3627_v2 }
 0x534   : > { %3020 = vmatprep.subr.bf16.mxu0 %v3625_v1 }
 0x537   : > { %3022 = vmatpush3.bf16.msra.mxu0 %v4025_v36 }
 0x538   : > { %3023 = vmatprep.subr.bf16.mxu0 %v3625_v1 }
 0x53b   : > { %3025 = vmatpush3.bf16.msra.mxu0 %v4031_v39 }
 0x53c   : > { %3026 = vmatprep.subr.bf16.mxu0 %v3625_v1 }
 0x53f   : > { %3028 = vmatpush3.bf16.msra.mxu0 %v4035_v42 }
 0x540   : > { %3029 = vmatprep.subr.bf16.mxu0 %v3625_v1 }
 0x543   : > { %3031 = vmatpush3.bf16.msra.mxu0 %v4039_v45 }
 0x544   : > { %3032 = vmatprep.subr.bf16.mxu0 %v3625_v1 }
 0x547   : > { %3034 = vmatpush3.bf16.msra.mxu0 %v4043_v48 }
 0x548   : > { %3035 = vmatprep.subr.bf16.mxu0 %v3625_v1 }
 0x54b   : > { %3037 = vmatpush3.bf16.msra.mxu0 %v4047_v51 }
 0x54c   : > { %3038 = vmatprep.subr.bf16.mxu0 %v3625_v1 }
 0x54f   : > { %3040 = vmatpush3.bf16.msra.mxu0 %v4051_v54 }
 0x550   : > { %3089 = vmatprep.subr.bf16.mxu0 %v3625_v1 }
 0x552   : > { %2554 = vmatmul.mubr.msk.f32.vlgmr.msra.gmra.mrb[4].mxu0 %vm429_vm7, %v3629_v58 }
 0x553   : > { %3091 = vmatpush3.bf16.msra.mxu0 %v3971_v10  ;;  %2658 = vmatprep.mubr.msk.f32.mxu0 %vm3626_vm0, %v3627_v2 }
 0x554   : > { %3092 = vmatprep.subr.bf16.mxu0 %v3625_v1 }
 0x557   : > { %3094 = vmatpush3.bf16.msra.mxu0 %v3974_v11 }
 0x558   : > { %3095 = vmatprep.subr.bf16.mxu0 %v3625_v1 }
 0x55b   : > { %3097 = vmatpush3.bf16.msra.mxu0 %v3981_v15 }
 0x55c   : > { %3098 = vmatprep.subr.bf16.mxu0 %v3625_v1 }
 0x55f   : > { %3100 = vmatpush3.bf16.msra.mxu0 %v3988_v18 }
 0x560   : > { %3101 = vmatprep.subr.bf16.mxu0 %v3625_v1 }
 0x563   : > { %3103 = vmatpush3.bf16.msra.mxu0 %v3994_v21 }
 0x564   : > { %3104 = vmatprep.subr.bf16.mxu0 %v3625_v1 }
 0x567   : > { %3106 = vmatpush3.bf16.msra.mxu0 %v4000_v24 }
 0x568   : > { %3107 = vmatprep.subr.bf16.mxu0 %v3625_v1 }
 0x56b   : > { %3109 = vmatpush3.bf16.msra.mxu0 %v4006_v27 }
 0x56c   : > { %3110 = vmatprep.subr.bf16.mxu0 %v3625_v1 }
 0x56f   : > { %3112 = vmatpush3.bf16.msra.mxu0 %v4012_v30 }
 0x570   : > { %3113 = vmatprep.subr.bf16.mxu0 %v3625_v1 }
 0x625   : > { %v1181_v47 = vpop.f32.mrb[4].mxu0 }
 0x626   : > { %3352 = vtanh.f32 %v1181_v47  ;;  %v2555_v49 = vpop.f32.mrb[5].mxu0 }
 0x630   : > { %v3353_v52 = vpop.eup %3352 }
 0x631   : > { %v1192_v53 = vsel %vm1191_vm8, %v3353_v52, %v1044_v43 }
 0x632   : > { %2589 = vmatmul.mubr.f32.vlgmr.msra.gmra.mrb[4].mxu1 %v1192_v53 }
 0x633   : > { %3067 = vmatpush3.bf16.msra.mxu1 %v4018_v33  ;;  %2623 = vmatprep.mubr.msk.f32.mxu1 %vm3626_vm0, %v3627_v2 }
 0x634   : > { %3068 = vmatprep.subr.bf16.mxu1 %v3625_v1 }
 0x637   : > { %3070 = vmatpush3.bf16.msra.mxu1 %v4025_v36 }
 0x638   : > { %3071 = vmatprep.subr.bf16.mxu1 %v3625_v1 }
 0x63b   : > { %3073 = vmatpush3.bf16.msra.mxu1 %v4031_v39 }
 0x63c   : > { %3074 = vmatprep.subr.bf16.mxu1 %v3625_v1 }
 0x63f   : > { %3076 = vmatpush3.bf16.msra.mxu1 %v4035_v42 }
 0x640   : > { %3077 = vmatprep.subr.bf16.mxu1 %v3625_v1 }
 0x643   : > { %3079 = vmatpush3.bf16.msra.mxu1 %v4039_v45 }
 0x644   : > { %3080 = vmatprep.subr.bf16.mxu1 %v3625_v1 }
 0x647   : > { %3082 = vmatpush3.bf16.msra.mxu1 %v4043_v48 }
 0x648   : > { %3083 = vmatprep.subr.bf16.mxu1 %v3625_v1 }
 0x64b   : > { %3085 = vmatpush3.bf16.msra.mxu1 %v4047_v51 }
 0x64c   : > { %3086 = vmatprep.subr.bf16.mxu1 %v3625_v1 }
 0x64f   : > { %3088 = vmatpush3.bf16.msra.mxu1 %v4051_v54 }
 0x650   : > { %3137 = vmatprep.subr.bf16.mxu1 %v3625_v1 }
 0x652   : > { %2624 = vmatmul.mubr.msk.f32.vlgmr.msra.gmra.mrb[4].mxu1 %vm436_vm10, %v3629_v58 }
 0x653   : > { %3139 = vmatpush3.bf16.msra.mxu1 %v3971_v10  ;;  %2728 = vmatprep.mubr.msk.f32.mxu1 %vm3626_vm0, %v3627_v2  ;;  %v1483_v10 = vsel %vm1482_vm11, 1, %v3624_v0 }
 0x654   : > { %3140 = vmatprep.subr.bf16.mxu1 %v3625_v1  ;;  %1485 = vperm.xlu0 %3341, %v1483_v10  }
 0x657   : > { %3142 = vmatpush3.bf16.msra.mxu1 %v3974_v11  ;;  %v3635_v11 = vmov 7  }
 0x658   : > { %3143 = vmatprep.subr.bf16.mxu1 %v3625_v1  ;;  %3342 = vset.pattern.permute.xlu1 %v3635_v11 }
 0x659   : > { %447 = vperm.xlu1 %3342, %v3964_v3  }
 0x65b   : > { %3145 = vmatpush3.bf16.msra.mxu1 %v3981_v15 }
 0x65c   : > { %3146 = vmatprep.subr.bf16.mxu1 %v3625_v1 }
 0x65d   : > { %3343 = vset.pattern.permute.xlu1 %v3624_v0  ;;  %v1645_v0 = vld [vmem:[#allocation10 + $0x40] sm:$0xff] }
 0x65e   : > { %1633 = vperm.xlu1 %3343, %v1631_v60   ;;  %v3198_v13 = vpack.c.bf16 %v1646_v12, %v1645_v0 }
 0x65f   : > { %3148 = vmatpush3.bf16.msra.mxu1 %v3988_v18 }
 0x660   : > { %3149 = vmatprep.subr.bf16.mxu1 %v3625_v1 }
 0x663   : > { %3151 = vmatpush3.bf16.msra.mxu1 %v3994_v21  ;;  %v1338_v21 = vpop.permute.xlu1 %1337 }
 0x664   : > { %3152 = vmatprep.subr.bf16.mxu1 %v3625_v1  ;;  %vm1339_vm12 = vcmp.eq.s32.totalorder %v1338_v21, 1 }
 0x667   : > { %3154 = vmatpush3.bf16.msra.mxu1 %v4000_v24  ;;  %v441_v3 = vpop.permute.xlu1 %440 }
 0x668   : > { %3155 = vmatprep.subr.bf16.mxu1 %v3625_v1  ;;  %vm442_vm13 = vcmp.eq.s32.totalorder %v4056_v56, %v441_v3 }
 0x669   : > { %vm443_vm14 = vmor %vm442_vm13, %vm400_vm2 }
 0x66b   : > { %3157 = vmatpush3.bf16.msra.mxu1 %v4006_v27 }
 0x66c   : > { %3158 = vmatprep.subr.bf16.mxu1 %v3625_v1 }
 0x66f   : > { %3160 = vmatpush3.bf16.msra.mxu1 %v4012_v30  ;;  %v1637_v30 = vld [vmem:[#allocation10] sm:$0xff] }
 0x670   : > { %3161 = vmatprep.subr.bf16.mxu1 %v3625_v1  ;;  %v3186_v61 = vpack.c.bf16 %v1638_v57, %v1637_v30 }
 0x6d3   : > { %v1486_v17 = vpop.permute.xlu0 %1485 }
 0x6d4   : > { %vm1487_vm1 = vcmp.eq.s32.totalorder %v1486_v17, 1 }
 0x725   : > { %v1329_v15 = vpop.f32.mrb[4].mxu1 }
 0x726   : > { %3354 = vtanh.f32 %v1329_v15  ;;  %v2625_v18 = vpop.f32.mrb[5].mxu1 }
 0x730   : > { %v3355_v24 = vpop.eup %3354 }
 0x731   : > { %v1340_v27 = vsel %vm1339_vm12, %v3355_v24, %v1192_v53 }
 0x732   : > { %2659 = vmatmul.mubr.f32.vlgmr.msra.gmra.mrb[6].mxu0 %v1340_v27 }
 0x733   : > { %3115 = vmatpush3.bf16.msra.mxu0 %v4018_v33  ;;  %2693 = vmatprep.mubr.msk.f32.mxu0 %vm3626_vm0, %v3627_v2 }
 0x734   : > { %3116 = vmatprep.subr.bf16.mxu0 %v3625_v1 }
 0x737   : > { %3118 = vmatpush3.bf16.msra.mxu0 %v4025_v36 }
 0x738   : > { %3119 = vmatprep.subr.bf16.mxu0 %v3625_v1 }
 0x73b   : > { %3121 = vmatpush3.bf16.msra.mxu0 %v4031_v39 }
 0x73c   : > { %3122 = vmatprep.subr.bf16.mxu0 %v3625_v1 }
 0x73f   : > { %3124 = vmatpush3.bf16.msra.mxu0 %v4035_v42 }
 0x740   : > { %3125 = vmatprep.subr.bf16.mxu0 %v3625_v1 }
 0x743   : > { %3127 = vmatpush3.bf16.msra.mxu0 %v4039_v45 }
 0x744   : > { %3128 = vmatprep.subr.bf16.mxu0 %v3625_v1 }
 0x747   : > { %3130 = vmatpush3.bf16.msra.mxu0 %v4043_v48 }
 0x748   : > { %3131 = vmatprep.subr.bf16.mxu0 %v3625_v1 }
 0x74b   : > { %3133 = vmatpush3.bf16.msra.mxu0 %v4047_v51 }
 0x74c   : > { %3134 = vmatprep.subr.bf16.mxu0 %v3625_v1 }
 0x74f   : > { %3136 = vmatpush3.bf16.msra.mxu0 %v4051_v54 }
 0x750   : > { %3185 = vmatprep.subr.bf16.mxu0 %v3625_v1 }
 0x752   : > { %2694 = vmatmul.mubr.msk.f32.vlgmr.msra.gmra.mrb[6].mxu0 %vm443_vm14, %v3629_v58 }
 0x753   : > { %2798 = vmatprep.mubr.msk.f32.mxu0 %vm3626_vm0, %v3627_v2  ;;  %3187 = vmatpush3.bf16.msra.mxu0 %v3186_v61 }
 0x754   : > { %3188 = vmatprep.subr.bf16.mxu0 %v3625_v1 }
 0x757   : > { %3190 = vmatpush3.bf16.msra.mxu0 %v3189_v63 }
 0x758   : > { %3191 = vmatprep.subr.bf16.mxu0 %v3625_v1 }
 0x75b   : > { %3193 = vmatpush3.bf16.msra.mxu0 %v3192_v7 }
 0x75c   : > { %3194 = vmatprep.subr.bf16.mxu0 %v3625_v1 }
 0x75f   : > { %3196 = vmatpush3.bf16.msra.mxu0 %v3195_v9 }
 0x760   : > { %3197 = vmatprep.subr.bf16.mxu0 %v3625_v1 }
 0x763   : > { %3199 = vmatpush3.bf16.msra.mxu0 %v3198_v13 }
 0x764   : > { %3200 = vmatprep.subr.bf16.mxu0 %v3625_v1 }
 0x825   : > { %v1477_v14 = vpop.f32.mrb[6].mxu0 }
 0x826   : > { %3356 = vtanh.f32 %v1477_v14  ;;  %v2695_v16 = vpop.f32.mrb[7].mxu0 }
 0x830   : > { %v3357_v19 = vpop.eup %3356 }
 0x831   : > { %v1488_v20 = vsel %vm1487_vm1, %v3357_v19, %v1340_v27 }
 0x832   : > { %2729 = vmatmul.mubr.f32.vlgmr.msra.gmra.mrb[6].mxu1 %v1488_v20 }
 0x833   : > { %3163 = vmatpush3.bf16.msra.mxu1 %v4018_v33  ;;  %2763 = vmatprep.mubr.msk.f32.mxu1 %vm3626_vm0, %v3627_v2  ;;  %v448_v2 = vpop.permute.xlu1 %447  ;;  %v1647_v33 = vld [vmem:[#allocation10 + $0x50] sm:$0xff] }
 0x834   : > { %3164 = vmatprep.subr.bf16.mxu1 %v3625_v1  ;;  %vm449_vm0 = vcmp.eq.s32.totalorder %v4056_v56, %v448_v2  ;;  %v1652_v56 = vld [vmem:[#allocation10 + $0x78] sm:$0xff] }
 0x835   : > { %vm450_vm3 = vmor %vm449_vm0, %vm400_vm2 }
 0x837   : > { %3166 = vmatpush3.bf16.msra.mxu1 %v4025_v36  ;;  %v1648_v36 = vld [vmem:[#allocation10 + $0x58] sm:$0xff]  ;;  %v1634_v23 = vpop.permute.xlu1 %1633 }
 0x838   : > { %3167 = vmatprep.subr.bf16.mxu1 %v3625_v1  ;;  %vm1635_vm2 = vcmp.eq.s32.totalorder %v1634_v23, 1 }
 0x83b   : > { %3169 = vmatpush3.bf16.msra.mxu1 %v4031_v39  ;;  %v3201_v39 = vpack.c.bf16 %v1648_v36, %v1647_v33 }
 0x83c   : > { %3170 = vmatprep.subr.bf16.mxu1 %v3625_v1 }
 0x83d   : > { %3202 = vmatpush3.bf16.msra.mxu0 %v3201_v39 }
 0x83e   : > { %3203 = vmatprep.subr.bf16.mxu0 %v3625_v1 }
 0x83f   : > { %3172 = vmatpush3.bf16.msra.mxu1 %v4035_v42  ;;  %v1649_v42 = vld [vmem:[#allocation10 + $0x60] sm:$0xff] }
 0x840   : > { %3173 = vmatprep.subr.bf16.mxu1 %v3625_v1 }
 0x843   : > { %3175 = vmatpush3.bf16.msra.mxu1 %v4039_v45  ;;  %v1650_v45 = vld [vmem:[#allocation10 + $0x68] sm:$0xff] }
 0x844   : > { %3176 = vmatprep.subr.bf16.mxu1 %v3625_v1 }
 0x847   : > { %3178 = vmatpush3.bf16.msra.mxu1 %v4043_v48  ;;  %v3204_v48 = vpack.c.bf16 %v1650_v45, %v1649_v42 }
 0x848   : > { %3179 = vmatprep.subr.bf16.mxu1 %v3625_v1 }
 0x849   : > { %3205 = vmatpush3.bf16.msra.mxu0 %v3204_v48 }
 0x84a   : > { %3206 = vmatprep.subr.bf16.mxu0 %v3625_v1 }
 0x84b   : > { %3181 = vmatpush3.bf16.msra.mxu1 %v4047_v51  ;;  %v1651_v51 = vld [vmem:[#allocation10 + $0x70] sm:$0xff] }
 0x84c   : > { %3182 = vmatprep.subr.bf16.mxu1 %v3625_v1  ;;  %v3207_v22 = vpack.c.bf16 %v1652_v56, %v1651_v51 }
 0x84e   : > { %3208 = vmatpush3.bf16.msra.mxu0 %v3207_v22 }
 0x84f   : > { %3184 = vmatpush3.bf16.msra.mxu1 %v4051_v54 }
 0x852   : > { %2764 = vmatmul.mubr.msk.f32.vlgmr.msra.gmra.mrb[6].mxu1 %vm450_vm3, %v3629_v58 }
 0x925   : > { %v1625_v54 = vpop.f32.mrb[6].mxu1 }
 0x926   : > { %3358 = vtanh.f32 %v1625_v54  ;;  %v2765_v58 = vpop.f32.mrb[7].mxu1 }
 0x930   : > { %v3359_v25 = vpop.eup %3358 }
 0x931   : > { %v1636_v26 = vsel %vm1635_vm2, %v3359_v25, %v1488_v20 }
 0x932   : > { %2799 = vmatmul.mubr.f32.vlgmr.msra.gmra.mrb[8].mxu0 %v1636_v26 }
 0xa05   : > { %v1726_v29 = vpop.f32.mrb[8].mxu0 }
 0xa06   : > { %v1727_v1 = vadd.f32 %v1912_v28, %v1726_v29  ;;  %v2800_v31 = vpop.f32.mrb[9].mxu0 }
 0xa08   : > { %1730 = vst [vmem:[%s359_s3] sm:$0xff] %v1727_v1 }
 0xa09   : > { %3545 = shalt.err (!%p3542_p6)
}
 0xa0a   : > { %s3546_s11 = scalar_lea.hbm %s4362_s30, 128  ;;  %s3550_s19 = scalar_lea.hbm %s4412_s6, 256 }
 0xa0b   : > { %p3547_p11 = scmp.ne.s32.totalorder %s4362_s30, %s3546_s11  ;;  %p3551_p12 = scmp.lt.u32.totalorder %s4362_s30, %s4412_s6 }
 0xa0c   : > { %p3552_p3 = scmp.lt.u32.totalorder %s3550_s19, %s3546_s11  ;;  %p3554_p0 = scmp.lt.u32.totalorder %s3546_s11, %s4362_s30 }
 0xa0d   : > { %p3548_p1 = pnand %p3547_p11, %p4440_p2 }
 0xa0e   : > { %p3553_p13 = por %p3552_p3, %p3551_p12 }
 0xa0f   : > { %p3549_p9 = pneg %p3548_p1 }
 0xa10   : > { %p3555_p4 = por %p3554_p0, %p3553_p13 }
 0xa12   : > { %p3556_p10 = pnand %p3555_p4, %p3549_p9 }
 0xa14   : > { %3559 = shalt.err (!%p3556_p10)
}
 0xa15   : > { %3245 = dma.vmem_to_hbm [thread:$0]  (%p4440_p2), %s4364_s26, 128, %s4362_s30, %s1732_s4  }
 0xa16 PF: > { %s1757_s13 = sand.u32 1, %s3602_s21   ;;  %p4441_p5 = scmp.ne.s32.totalorder %s4430_s29, 0 }
 0xa17   : > { %p4442_p7 = scmp.ge.s32.totalorder %s3614_s24, 2  ;;  %s1758_s14 = scalar_lea.sflag [#allocation4], %s1757_s13 }
 0xa19   : > { %p3268_p8 = pnand %p4442_p7, %p4441_p5 }
 0xa1b   : > { %3597 = dma.done.wait (!%p3268_p8), %s1758_s14, 128  }
 0xa1c   : > { %3599 = vsyncadd (!%p3268_p8), %s1758_s14, 4294967168  ;;  %p24_p6 = scmp.ge.s32.totalorder %s3821_s7, 4   ;;  %s4443_s21 = smov %s3606_s22 }
 0xa1d   : > { %s4444_s22 = smov %s3610_s23  ;;  %s4445_s23 = smov %s3832_s16 }
 0xa1e   : > { %s4446_s24 = smov %s3821_s7  ;;  %26 = sbr.rel (!%p24_p6) target bundleno = 13 (0xd), region = 118 }
 0xa25   :  { %1763 = vsyncpa [#allocation3], 1 }
 0xa26   :  { %1765 = vsyncpa [#allocation3 + $0x1], 1 }
 0xa27   :  { %1766 = vsyncpa [#allocation6], 1 }
 0xa28   :  { %1768 = vsyncpa [#allocation6 + $0x1], 1 }
 0xa29   :  { %1769 = vsyncpa [#allocation9], 1 }
 0xa2a   :  { %1770 = vsyncpa [#allocation12], 1 }
 0xa2b   :  { %1771 = vsyncpa [#allocation4], 1 }
 0xa2c   :  { %1773 = vsyncpa [#allocation4 + $0x1], 1 }

</bundles_post_ra>
